<compile_context>
chip_gen: v5e
topology: v5e:2x2
jax: 0.10.0
libtpu: 0.0.40
codegen_flags: <defaults>
</compile_context>

<pallas_src>
import jax
import jax.numpy as jnp
from jax.experimental import pallas as pl
from jax.experimental.pallas import tpu as pltpu


def _conv_block_kernel(x_ref, w_ref, b_ref, o_ref):
    # x_ref: (1, H, W, Cin)  unpadded NHWC tile (one batch element, all channels)
    # w_ref: (9, Cin, Cout)  conv taps, tap index k = di*3 + dj
    # b_ref: (1, Cout)
    # o_ref: (1, H*W, Cout)  flattened-spatial output
    _, H, W, Cin = x_ref.shape
    _, _, Cout = w_ref.shape

    xb = x_ref[0].astype(jnp.float32)                                   # (H, W, Cin)

    # Fused ReflectionPad2d(1): build the (H+2, W+2, Cin) padded view in VMEM.
    xr = jnp.concatenate([xb[1:2], xb, xb[H - 2:H - 1]], axis=0)        # rows
    xp = jnp.concatenate([xr[:, 1:2], xr, xr[:, W - 2:W - 1]], axis=1)  # cols

    acc = jnp.zeros((H * W, Cout), jnp.float32)
    # 3x3 conv as 9 shifted (H*W, Cin) @ (Cin, Cout) MXU matmuls.
    for dj in range(3):
        # Column-shifted slab, flattened so every row shift is a contiguous
        # static slice (single reshape per column tap, lane dim unchanged).
        col = xp[:, dj:dj + W, :].reshape((H + 2) * W, Cin)
        for di in range(3):
            xs = col[di * W:(di + H) * W, :]                            # (H*W, Cin)
            acc = acc + jnp.dot(xs, w_ref[di * 3 + dj],
                                preferred_element_type=jnp.float32)

    z = acc + b_ref[...].astype(jnp.float32)                            # + (1, Cout)
    # ELU (alpha = 1.0), exp goes to the EUP slot.
    out = jnp.where(z > 0.0, z, jnp.exp(jnp.minimum(z, 0.0)) - 1.0)
    o_ref[0, :, :] = out.astype(o_ref.dtype)


def conv_block(x, w, b):
    """x: (N, Cin, H, W); w: (Cout, Cin, 3, 3); b: (Cout,) -> (N, Cout, H, W)."""
    N, Cin, H, W = x.shape
    Cout = w.shape[0]

    # NHWC so channels sit on the lane dim and (H*W, Cin) slabs feed the MXU.
    x_nhwc = jnp.transpose(x, (0, 2, 3, 1))
    w9 = jnp.transpose(w, (2, 3, 1, 0)).reshape(9, Cin, Cout)  # tap-major weights
    b2 = b.reshape(1, Cout)

    out = pl.pallas_call(
        _conv_block_kernel,
        out_shape=jax.ShapeDtypeStruct((N, H * W, Cout), x.dtype),
        grid_spec=pltpu.PrefetchScalarGridSpec(
            num_scalar_prefetch=0,
            grid=(N,),  # one full image (all channels) per step; grid >= 2 so
                        # both v7x TensorCores get work via "parallel".
            in_specs=[
                pl.BlockSpec((1, H, W, Cin), lambda n: (n, 0, 0, 0)),
                pl.BlockSpec((9, Cin, Cout), lambda n: (0, 0, 0)),
                pl.BlockSpec((1, Cout), lambda n: (0, 0)),
            ],
            out_specs=pl.BlockSpec((1, H * W, Cout), lambda n: (n, 0, 0)),
        ),
        compiler_params=pltpu.CompilerParams(
            dimension_semantics=("parallel",)),
    )(x_nhwc, w9, b2)
    # TODO(synk): for large H*W (v7x's 64 MiB VMEM), tile H into strips with a
    # 2-row halo in the index_map and cap vmem_limit_bytes, instead of taking
    # one full image per grid step.
    return jnp.transpose(out.reshape(N, H, W, Cout), (0, 3, 1, 2))


def _conv_block_ref(x, w, b):
    """Pure-JAX reference mirroring the PyTorch ConvBlock forward."""
    N, Cin, H, W = x.shape
    xp = jnp.pad(x, ((0, 0), (0, 0), (1, 1), (1, 1)), mode="reflect")
    out = jnp.zeros((N, w.shape[0], H, W), jnp.float32)
    for di in range(3):
        for dj in range(3):
            xs = xp[:, :, di:di + H, dj:dj + W]
            out = out + jnp.einsum("ncij,oc->noij", xs, w[:, :, di, dj])
    out = out + b[None, :, None, None]
    return jnp.where(out > 0.0, out, jnp.exp(jnp.minimum(out, 0.0)) - 1.0)


if __name__ == "__main__":
    key = jax.random.PRNGKey(0)
    kx, kw, kb = jax.random.split(key, 3)
    N, Cin, Cout, H, W = 2, 4, 8, 16, 16
    x = jax.random.uniform(kx, (N, Cin, H, W), dtype=jnp.float32)
    w = jax.random.normal(kw, (Cout, Cin, 3, 3), dtype=jnp.float32) * 0.1
    b = jax.random.normal(kb, (Cout,), dtype=jnp.float32) * 0.1

    out = jax.block_until_ready(conv_block(x, w, b))
    ref = jax.block_until_ready(_conv_block_ref(x, w, b))
    assert out.shape == (N, Cout, H, W)
    assert jnp.allclose(out, ref, atol=1e-3, rtol=1e-3), float(
        jnp.max(jnp.abs(out - ref)))
    print("KERNEL_OK")
</pallas_src>

<mosaic_0001>
module attributes {stable_mosaic.version = 11 : i64} {
  func.func @_conv_block_kernel(%arg0: i32, %arg1: memref<1x16x16x4xf32, #tpu.memory_space<vmem>>, %arg2: memref<9x4x8xf32, #tpu.memory_space<vmem>>, %arg3: memref<1x8xf32, #tpu.memory_space<vmem>>, %arg4: memref<1x256x8xf32, #tpu.memory_space<vmem>>) attributes {dimension_semantics = [#tpu.dimension_semantics<parallel>], iteration_bounds = array<i64: 2>, scalar_prefetch = 0 : i64, scratch_operands = 0 : i64, tpu.core_type = #tpu.core_type<tc>, window_params = [{transform_indices = @transform_0, window_bounds = array<i64: 1, 16, 16, 4>}, {pipeline_mode = #tpu.pipeline_mode<synchronous>, transform_indices = @transform_1, window_bounds = array<i64: 9, 4, 8>}, {pipeline_mode = #tpu.pipeline_mode<synchronous>, transform_indices = @transform_2, window_bounds = array<i64: 1, 8>}, {transform_indices = @transform_3, window_bounds = array<i64: 1, 256, 8>}]} {
    %c0 = arith.constant 0 : index
    %c0_0 = arith.constant 0 : index
    %c0_1 = arith.constant 0 : index
    %c0_2 = arith.constant 0 : index
    %0 = vector.load %arg1[%c0, %c0_0, %c0_1, %c0_2] : memref<1x16x16x4xf32, #tpu.memory_space<vmem>>, vector<1x16x16x4xf32>
    %1 = vector.shape_cast %0 : vector<1x16x16x4xf32> to vector<16x16x4xf32>
    %2 = vector.extract_strided_slice %1 {offsets = [1, 0, 0], sizes = [1, 16, 4], strides = [1, 1, 1]} : vector<16x16x4xf32> to vector<1x16x4xf32>
    %3 = vector.extract_strided_slice %1 {offsets = [14, 0, 0], sizes = [1, 16, 4], strides = [1, 1, 1]} : vector<16x16x4xf32> to vector<1x16x4xf32>
    %4 = tpu.concatenate %2, %1, %3 in 0 : vector<1x16x4xf32>, vector<16x16x4xf32>, vector<1x16x4xf32> -> vector<18x16x4xf32>
    %5 = vector.extract_strided_slice %4 {offsets = [0, 1, 0], sizes = [18, 1, 4], strides = [1, 1, 1]} : vector<18x16x4xf32> to vector<18x1x4xf32>
    %6 = vector.extract_strided_slice %4 {offsets = [0, 14, 0], sizes = [18, 1, 4], strides = [1, 1, 1]} : vector<18x16x4xf32> to vector<18x1x4xf32>
    %7 = tpu.concatenate %5, %4, %6 in 1 : vector<18x1x4xf32>, vector<18x16x4xf32>, vector<18x1x4xf32> -> vector<18x18x4xf32>
    %cst = arith.constant 0.000000e+00 : f32
    %8 = vector.broadcast %cst : f32 to vector<256x8xf32>
    %9 = vector.extract_strided_slice %7 {offsets = [0, 0, 0], sizes = [18, 16, 4], strides = [1, 1, 1]} : vector<18x18x4xf32> to vector<18x16x4xf32>
    %10 = vector.shape_cast %9 : vector<18x16x4xf32> to vector<288x4xf32>
    %11 = vector.extract_strided_slice %10 {offsets = [0, 0], sizes = [256, 4], strides = [1, 1]} : vector<288x4xf32> to vector<256x4xf32>
    %c0_3 = arith.constant 0 : index
    %c0_4 = arith.constant 0 : index
    %c0_5 = arith.constant 0 : index
    %12 = vector.load %arg2[%c0_3, %c0_4, %c0_5] : memref<9x4x8xf32, #tpu.memory_space<vmem>>, vector<1x4x8xf32>
    %13 = vector.shape_cast %12 : vector<1x4x8xf32> to vector<4x8xf32>
    %cst_6 = arith.constant dense<0.000000e+00> : vector<256x8xf32>
    %14 = tpu.matmul %11, %13, %cst_6 {dimension_numbers = #tpu.dot_dimension_numbers<[1], [0], [0], [1], [0, 0, 1, 1], [], []>} : vector<256x4xf32>, vector<4x8xf32>, vector<256x8xf32> -> vector<256x8xf32>
    %15 = arith.addf %8, %14 : vector<256x8xf32>
    %16 = vector.extract_strided_slice %10 {offsets = [16, 0], sizes = [256, 4], strides = [1, 1]} : vector<288x4xf32> to vector<256x4xf32>
    %c3 = arith.constant 3 : index
    %c0_7 = arith.constant 0 : index
    %c0_8 = arith.constant 0 : index
    %17 = vector.load %arg2[%c3, %c0_7, %c0_8] : memref<9x4x8xf32, #tpu.memory_space<vmem>>, vector<1x4x8xf32>
    %18 = vector.shape_cast %17 : vector<1x4x8xf32> to vector<4x8xf32>
    %cst_9 = arith.constant dense<0.000000e+00> : vector<256x8xf32>
    %19 = tpu.matmul %16, %18, %cst_9 {dimension_numbers = #tpu.dot_dimension_numbers<[1], [0], [0], [1], [0, 0, 1, 1], [], []>} : vector<256x4xf32>, vector<4x8xf32>, vector<256x8xf32> -> vector<256x8xf32>
    %20 = arith.addf %15, %19 : vector<256x8xf32>
    %21 = vector.extract_strided_slice %10 {offsets = [32, 0], sizes = [256, 4], strides = [1, 1]} : vector<288x4xf32> to vector<256x4xf32>
    %c6 = arith.constant 6 : index
    %c0_10 = arith.constant 0 : index
    %c0_11 = arith.constant 0 : index
    %22 = vector.load %arg2[%c6, %c0_10, %c0_11] : memref<9x4x8xf32, #tpu.memory_space<vmem>>, vector<1x4x8xf32>
    %23 = vector.shape_cast %22 : vector<1x4x8xf32> to vector<4x8xf32>
    %cst_12 = arith.constant dense<0.000000e+00> : vector<256x8xf32>
    %24 = tpu.matmul %21, %23, %cst_12 {dimension_numbers = #tpu.dot_dimension_numbers<[1], [0], [0], [1], [0, 0, 1, 1], [], []>} : vector<256x4xf32>, vector<4x8xf32>, vector<256x8xf32> -> vector<256x8xf32>
    %25 = arith.addf %20, %24 : vector<256x8xf32>
    %26 = vector.extract_strided_slice %7 {offsets = [0, 1, 0], sizes = [18, 16, 4], strides = [1, 1, 1]} : vector<18x18x4xf32> to vector<18x16x4xf32>
    %27 = vector.shape_cast %26 : vector<18x16x4xf32> to vector<288x4xf32>
    %28 = vector.extract_strided_slice %27 {offsets = [0, 0], sizes = [256, 4], strides = [1, 1]} : vector<288x4xf32> to vector<256x4xf32>
    %c1 = arith.constant 1 : index
    %c0_13 = arith.constant 0 : index
    %c0_14 = arith.constant 0 : index
    %29 = vector.load %arg2[%c1, %c0_13, %c0_14] : memref<9x4x8xf32, #tpu.memory_space<vmem>>, vector<1x4x8xf32>
    %30 = vector.shape_cast %29 : vector<1x4x8xf32> to vector<4x8xf32>
    %cst_15 = arith.constant dense<0.000000e+00> : vector<256x8xf32>
    %31 = tpu.matmul %28, %30, %cst_15 {dimension_numbers = #tpu.dot_dimension_numbers<[1], [0], [0], [1], [0, 0, 1, 1], [], []>} : vector<256x4xf32>, vector<4x8xf32>, vector<256x8xf32> -> vector<256x8xf32>
    %32 = arith.addf %25, %31 : vector<256x8xf32>
    %33 = vector.extract_strided_slice %27 {offsets = [16, 0], sizes = [256, 4], strides = [1, 1]} : vector<288x4xf32> to vector<256x4xf32>
    %c4 = arith.constant 4 : index
    %c0_16 = arith.constant 0 : index
    %c0_17 = arith.constant 0 : index
    %34 = vector.load %arg2[%c4, %c0_16, %c0_17] : memref<9x4x8xf32, #tpu.memory_space<vmem>>, vector<1x4x8xf32>
    %35 = vector.shape_cast %34 : vector<1x4x8xf32> to vector<4x8xf32>
    %cst_18 = arith.constant dense<0.000000e+00> : vector<256x8xf32>
    %36 = tpu.matmul %33, %35, %cst_18 {dimension_numbers = #tpu.dot_dimension_numbers<[1], [0], [0], [1], [0, 0, 1, 1], [], []>} : vector<256x4xf32>, vector<4x8xf32>, vector<256x8xf32> -> vector<256x8xf32>
    %37 = arith.addf %32, %36 : vector<256x8xf32>
    %38 = vector.extract_strided_slice %27 {offsets = [32, 0], sizes = [256, 4], strides = [1, 1]} : vector<288x4xf32> to vector<256x4xf32>
    %c7 = arith.constant 7 : index
    %c0_19 = arith.constant 0 : index
    %c0_20 = arith.constant 0 : index
    %39 = vector.load %arg2[%c7, %c0_19, %c0_20] : memref<9x4x8xf32, #tpu.memory_space<vmem>>, vector<1x4x8xf32>
    %40 = vector.shape_cast %39 : vector<1x4x8xf32> to vector<4x8xf32>
    %cst_21 = arith.constant dense<0.000000e+00> : vector<256x8xf32>
    %41 = tpu.matmul %38, %40, %cst_21 {dimension_numbers = #tpu.dot_dimension_numbers<[1], [0], [0], [1], [0, 0, 1, 1], [], []>} : vector<256x4xf32>, vector<4x8xf32>, vector<256x8xf32> -> vector<256x8xf32>
    %42 = arith.addf %37, %41 : vector<256x8xf32>
    %43 = vector.extract_strided_slice %7 {offsets = [0, 2, 0], sizes = [18, 16, 4], strides = [1, 1, 1]} : vector<18x18x4xf32> to vector<18x16x4xf32>
    %44 = vector.shape_cast %43 : vector<18x16x4xf32> to vector<288x4xf32>
    %45 = vector.extract_strided_slice %44 {offsets = [0, 0], sizes = [256, 4], strides = [1, 1]} : vector<288x4xf32> to vector<256x4xf32>
    %c2 = arith.constant 2 : index
    %c0_22 = arith.constant 0 : index
    %c0_23 = arith.constant 0 : index
    %46 = vector.load %arg2[%c2, %c0_22, %c0_23] : memref<9x4x8xf32, #tpu.memory_space<vmem>>, vector<1x4x8xf32>
    %47 = vector.shape_cast %46 : vector<1x4x8xf32> to vector<4x8xf32>
    %cst_24 = arith.constant dense<0.000000e+00> : vector<256x8xf32>
    %48 = tpu.matmul %45, %47, %cst_24 {dimension_numbers = #tpu.dot_dimension_numbers<[1], [0], [0], [1], [0, 0, 1, 1], [], []>} : vector<256x4xf32>, vector<4x8xf32>, vector<256x8xf32> -> vector<256x8xf32>
    %49 = arith.addf %42, %48 : vector<256x8xf32>
    %50 = vector.extract_strided_slice %44 {offsets = [16, 0], sizes = [256, 4], strides = [1, 1]} : vector<288x4xf32> to vector<256x4xf32>
    %c5 = arith.constant 5 : index
    %c0_25 = arith.constant 0 : index
    %c0_26 = arith.constant 0 : index
    %51 = vector.load %arg2[%c5, %c0_25, %c0_26] : memref<9x4x8xf32, #tpu.memory_space<vmem>>, vector<1x4x8xf32>
    %52 = vector.shape_cast %51 : vector<1x4x8xf32> to vector<4x8xf32>
    %cst_27 = arith.constant dense<0.000000e+00> : vector<256x8xf32>
    %53 = tpu.matmul %50, %52, %cst_27 {dimension_numbers = #tpu.dot_dimension_numbers<[1], [0], [0], [1], [0, 0, 1, 1], [], []>} : vector<256x4xf32>, vector<4x8xf32>, vector<256x8xf32> -> vector<256x8xf32>
    %54 = arith.addf %49, %53 : vector<256x8xf32>
    %55 = vector.extract_strided_slice %44 {offsets = [32, 0], sizes = [256, 4], strides = [1, 1]} : vector<288x4xf32> to vector<256x4xf32>
    %c8 = arith.constant 8 : index
    %c0_28 = arith.constant 0 : index
    %c0_29 = arith.constant 0 : index
    %56 = vector.load %arg2[%c8, %c0_28, %c0_29] : memref<9x4x8xf32, #tpu.memory_space<vmem>>, vector<1x4x8xf32>
    %57 = vector.shape_cast %56 : vector<1x4x8xf32> to vector<4x8xf32>
    %cst_30 = arith.constant dense<0.000000e+00> : vector<256x8xf32>
    %58 = tpu.matmul %55, %57, %cst_30 {dimension_numbers = #tpu.dot_dimension_numbers<[1], [0], [0], [1], [0, 0, 1, 1], [], []>} : vector<256x4xf32>, vector<4x8xf32>, vector<256x8xf32> -> vector<256x8xf32>
    %59 = arith.addf %54, %58 : vector<256x8xf32>
    %c0_31 = arith.constant 0 : index
    %c0_32 = arith.constant 0 : index
    %60 = vector.load %arg3[%c0_31, %c0_32] : memref<1x8xf32, #tpu.memory_space<vmem>>, vector<1x8xf32>
    %61 = vector.broadcast %60 : vector<1x8xf32> to vector<256x8xf32>
    %62 = arith.addf %59, %61 : vector<256x8xf32>
    %cst_33 = arith.constant 0.000000e+00 : f32
    %63 = vector.broadcast %cst_33 : f32 to vector<256x8xf32>
    %64 = arith.cmpf ogt, %62, %63 : vector<256x8xf32>
    %cst_34 = arith.constant 0.000000e+00 : f32
    %65 = vector.broadcast %cst_34 : f32 to vector<256x8xf32>
    %66 = arith.minimumf %62, %65 : vector<256x8xf32>
    %67 = math.exp %66 : vector<256x8xf32>
    %cst_35 = arith.constant 1.000000e+00 : f32
    %68 = vector.broadcast %cst_35 : f32 to vector<256x8xf32>
    %69 = arith.subf %67, %68 : vector<256x8xf32>
    %70 = arith.select %64, %62, %69 : vector<256x8xi1>, vector<256x8xf32>
    %c0_36 = arith.constant 0 : index
    %c0_37 = arith.constant 0 : index
    %c0_38 = arith.constant 0 : index
    %71 = vector.load %arg4[%c0_36, %c0_37, %c0_38] : memref<1x256x8xf32, #tpu.memory_space<vmem>>, vector<1x256x8xf32>
    %72 = vector.shape_cast %71 : vector<1x256x8xf32> to vector<256x8xf32>
    %73 = vector.shape_cast %70 : vector<256x8xf32> to vector<1x256x8xf32>
    tpu.vector_store %arg4[%c0_36, %c0_37, %c0_38], %73 {strides = array<i32>} : memref<1x256x8xf32, #tpu.memory_space<vmem>>, vector<1x256x8xf32>,
    return
  }
  func.func @transform_0(%arg0: i32) -> (i32, i32, i32, i32) {
    %c0_i32 = arith.constant 0 : i32
    %c0_i32_0 = arith.constant 0 : i32
    %c0_i32_1 = arith.constant 0 : i32
    %c0_i32_2 = arith.constant 0 : i32
    return %arg0, %c0_i32, %c0_i32_0, %c0_i32_1 : i32, i32, i32, i32
  }
  func.func @transform_1(%arg0: i32) -> (i32, i32, i32) {
    %c0_i32 = arith.constant 0 : i32
    %c0_i32_0 = arith.constant 0 : i32
    %c0_i32_1 = arith.constant 0 : i32
    %c0_i32_2 = arith.constant 0 : i32
    return %c0_i32, %c0_i32_0, %c0_i32_1 : i32, i32, i32
  }
  func.func @transform_2(%arg0: i32) -> (i32, i32) {
    %c0_i32 = arith.constant 0 : i32
    %c0_i32_0 = arith.constant 0 : i32
    %c0_i32_1 = arith.constant 0 : i32
    return %c0_i32, %c0_i32_0 : i32, i32
  }
  func.func @transform_3(%arg0: i32) -> (i32, i32, i32) {
    %c0_i32 = arith.constant 0 : i32
    %c0_i32_0 = arith.constant 0 : i32
    %c0_i32_1 = arith.constant 0 : i32
    return %arg0, %c0_i32, %c0_i32_0 : i32, i32, i32
  }
}

</mosaic_0001>

<bundles_post_ra>
// kernel: tpu_custom_call.1
= control target key start
LH: loop header
LB: loop body
LE: loop exit
PB: predicated region body
PF: predicated region fallthrough
CT: control target
= control target key end

     0   :  { %s2856_s12 = smov 0   ;;  %s4294_s0 = inlined_call_operand.vmem [shape: f32[2,16,16,4], index: 0, kind: input, shape index: {}]   ;;  %s4295_s1 = inlined_call_operand.vmem [shape: f32[9,4,8], index: 1, kind: input, shape index: {}]   ;;  %s4296_s2 = inlined_call_operand.vmem [shape: f32[1,8], index: 2, kind: input, shape index: {}]   ;;  %s4297_s3 = inlined_call_operand.vmem [shape: f32[2,256,8], index: 3, kind: output, shape index: {}]  }
   0x1 LB: > { %s2401_s13 = sadd.s32 4294967295, %s2834_s12   ;;  %p2405_p0 = scmp.ge.s32.totalorder %s2834_s12, 1  ;;  %s2834_s12 = sphi %s2856_s12, %s13_s12  }
   0x2   : > { %p137_p1 = scmp.lt.s32.totalorder %s2834_s12, 3 }
   0x4   : > { %p138_p2 = pnand %p2405_p0, %p137_p1 }
   0x6   : > { %141 = sbr.rel (%p138_p2) target bundleno = 744 (0x2e8), region = 32 }
   0xb   : > { %v2410_v0 = vld [vmem:[%s4295_s1 + $0xc] sm:$0xf]  ;;  %vm496_vm0 = vcmask 1043456   ;;  %p161_p3 = scmp.lt.s32.totalorder %s2401_s13, 1  ;;  %v2477_v1 = vld [vmem:[%s4295_s1 + $0x18] sm:$0xf] }
   0xc   : > { %2751 = vmatpush.msk.msra.mxu1 %vm496_vm0, %v2410_v0  ;;  %2752 = vmatpush.msk.msra.mxu2 %vm496_vm0, %v2410_v0  ;;  %v2511_v2 = vld [vmem:[%s4295_s1 + $0x4] sm:$0xf]  ;;  %v412_v3 = vld [vmem:[%s4295_s1] sm:$0xf]  ;;  %v2545_v4 = vld [vmem:[%s4295_s1 + $0x10] sm:$0xf] }
   0xd   : > { %s4492_s13 = smov (!%p161_p3, %s2401_s13), 1  ;;  %2753 = vmatpush.msk.msra.mxu3 %vm496_vm0, %v2410_v0  ;;  %2411 = vmatpush.msk.msra.mxu0 %vm496_vm0, %v2410_v0  ;;  %vm267_vm1 = vcmask 1040384   ;;  %vm415_vm2 = vcmask 31744   ;;  %vm895_vm3 = vcmask 1046528   ;;  %vm1490_vm4 = vcmask 1045504  }
   0xe   : > { %2478 = vmatpush.msk.msrb.mxu2 %vm496_vm0, %v2477_v1  ;;  %2444 = vmatpush.msk.msrb.mxu1 %vm496_vm0, %v412_v3  ;;  %s2749_s24 = sshll.u32 %s4492_s13, 8  ;;  %vm2313_vm5 = vcmask 64512  }
   0xf   : > { %2512 = vmatpush.msk.msrb.mxu3 %vm496_vm0, %v2511_v2  ;;  %s2894_s27 = scalar_lea.vmem %s4294_s0, %s2749_s24  ;;  %2546 = vmatpush.msk.msrb.mxu0 %vm496_vm0, %v2545_v4  ;;  %s4017_s15 = scalar_lea.vmem %s4297_s3, %s2749_s24 }
  0x10   : > { %v179_v5 = vld [vmem:[%s2894_s27 + $0x40] sm:$0xff]  ;;  %v2901_v14 = vld [vmem:[%s2894_s27 + $0x48] sm:$0xff]  ;;  %v181_v32 = vld [vmem:[%s2894_s27 + $0x50] sm:$0xff] }
  0x11   : > { %v187_v6 = vld [vmem:[%s2894_s27 + $0x80] sm:$0xff]  ;;  %v223_v8 = vrot.slane %v179_v5, 1  ;;  %v280_v9 = vrot.slane %v179_v5, 7  ;;  %v2904_v15 = vld [vmem:[%s2894_s27 + $0x88] sm:$0xff]  ;;  %v281_v23 = vrot.slane %v2901_v14, 7  ;;  %v189_v33 = vld [vmem:[%s2894_s27 + $0x90] sm:$0xff] }
  0x12   : > { %v195_v7 = vld [vmem:[%s2894_s27 + $0xc0] sm:$0xff]  ;;  %v227_v10 = vrot.slane %v187_v6, 1  ;;  %v292_v11 = vrot.slane %v187_v6, 7  ;;  %v2914_v20 = vld [vmem:[%s2894_s27 + $0xc8] sm:$0xff]  ;;  %v4305_v24 = vrot.slane %v2904_v15, 7  ;;  %v197_v34 = vld [vmem:[%s2894_s27 + $0xd0] sm:$0xff] }
  0x13   : > { %v231_v12 = vrot.slane %v195_v7, 1  ;;  %v304_v13 = vrot.slane %v195_v7, 7  ;;  %v171_v16 = vld [vmem:[%s2894_s27] sm:$0xff]  ;;  %v2908_v17 = vsel %vm267_vm1, %v223_v8, %v280_v9  ;;  %v2928_v25 = vld [vmem:[%s2894_s27 + $0x8] sm:$0xff]  ;;  %v4300_v27 = vrot.slane %v2914_v20, 7  ;;  %v173_v40 = vld [vmem:[%s2894_s27 + $0x10] sm:$0xff] }
  0x14   : > { %4338 = vst [vmem:[#allocation2_spill] sm:$0xff] %v2908_v17  ;;  %v2911_v18 = vsel %vm267_vm1, %v227_v10, %v292_v11  ;;  %v220_v19 = vrot.slane %v171_v16, 1  ;;  %2420 = vmatmul.msk.f32.vlgmr.msra.gmra.mxu1 %vm415_vm2, %v2908_v17  ;;  %v271_v22 = vrot.slane %v171_v16, 7  ;;  %v272_v28 = vrot.slane %v2928_v25, 7  ;;  %v2979_v48 = vld [vmem:[%s2894_s27 + $0x58] sm:$0xff]  ;;  %v183_v60 = vld [vmem:[%s2894_s27 + $0x60] sm:$0xff] }
  0x15   : > { %2428 = vmatmul.msk.f32.vlgmr.msra.gmra.mxu2 %vm415_vm2, %v2911_v18  ;;  %v2921_v21 = vsel %vm267_vm1, %v231_v12, %v304_v13  ;;  %v2940_v29 = vsel %vm267_vm1, %v280_v9, %v281_v23  ;;  %v2945_v30 = vsel %vm267_vm1, %v292_v11, %v4305_v24  ;;  %v2950_v31 = vsel %vm267_vm1, %v304_v13, %v4300_v27  ;;  %v2982_v49 = vld [vmem:[%s2894_s27 + $0x98] sm:$0xff]  ;;  %v191_v61 = vld [vmem:[%s2894_s27 + $0xa0] sm:$0xff]  ;;  %v3044_v11 = vld [vmem:[%s2894_s27 + $0x68] sm:$0xff] }
  0x16   : > { %2436 = vmatmul.msk.f32.vlgmr.msra.gmra.mxu3 %vm415_vm2, %v2921_v21  ;;  %v2931_v26 = vsel %vm267_vm1, %v220_v19, %v271_v22  ;;  %4339 = vst [vmem:[#allocation3_spill] sm:$0xff] %v2940_v29  ;;  %v2962_v35 = vsel %vm267_vm1, %v271_v22, %v272_v28  ;;  %v224_v36 = vrot.slane %v181_v32, 1  ;;  %v283_v37 = vrot.slane %v181_v32, 7  ;;  %v2985_v50 = vld [vmem:[%s2894_s27 + $0xd8] sm:$0xff]  ;;  %v199_v62 = vld [vmem:[%s2894_s27 + $0xe0] sm:$0xff]  ;;  %v3050_v13 = vld [vmem:[%s2894_s27 + $0xa8] sm:$0xff] }
  0x17   : > { %2412 = vmatmul.msk.f32.vlgmr.msra.gmra.mxu0 %vm415_vm2, %v2931_v26  ;;  %v228_v38 = vrot.slane %v189_v33, 1  ;;  %v295_v39 = vrot.slane %v189_v33, 7  ;;  %v232_v41 = vrot.slane %v197_v34, 1  ;;  %v307_v42 = vrot.slane %v197_v34, 7  ;;  %v2999_v54 = vld [vmem:[%s2894_s27 + $0x18] sm:$0xff]  ;;  %v175_v4 = vld [vmem:[%s2894_s27 + $0x20] sm:$0xff] }
  0x18   : > { %v219_v43 = vrot.slane %v173_v40, 1  ;;  %v268_v44 = vrot.slane %v173_v40, 7  ;;  %v2970_v45 = vsel %vm267_vm1, %v224_v36, %v283_v37  ;;  %v4308_v52 = vrot.slane %v2979_v48, 7  ;;  %v3053_v16 = vld [vmem:[%s2894_s27 + $0xe8] sm:$0xff]  ;;  %v2647_v36 = vld [vmem:[%s4295_s1 + $0x14] sm:$0xf] }
  0x19   : > { %4340 = vst [vmem:[#allocation4_spill] sm:$0xff] %v2970_v45  ;;  %v2973_v46 = vsel %vm267_vm1, %v228_v38, %v295_v39  ;;  %v2976_v47 = vsel %vm267_vm1, %v232_v41, %v307_v42  ;;  %v4304_v53 = vrot.slane %v2982_v49, 7  ;;  %v4299_v55 = vrot.slane %v2985_v50, 7  ;;  %v2613_v32 = vld [vmem:[%s4295_s1 + $0x8] sm:$0xf]  ;;  %2648 = vmatpush.msk.msra.mxu3 %vm496_vm0, %v2647_v36 }
  0x1a   : > { %v2992_v51 = vsel %vm267_vm1, %v219_v43, %v268_v44  ;;  %v269_v56 = vrot.slane %v2999_v54, 7  ;;  %v3008_v57 = vsel %vm267_vm1, %v283_v37, %v4308_v52  ;;  %v225_v0 = vrot.slane %v183_v60, 1  ;;  %v3070_v34 = vld [vmem:[%s2894_s27 + $0x28] sm:$0xff]  ;;  %2614 = vmatpush.msk.msra.mxu2 %vm496_vm0, %v2613_v32  ;;  %v2579_v37 = vld [vmem:[%s4295_s1 + $0x1c] sm:$0xf] }
  0x1b   : > { %4341 = vst [vmem:[#allocation5_spill] sm:$0xff] %v3008_v57  ;;  %v3013_v58 = vsel %vm267_vm1, %v295_v39, %v4304_v53  ;;  %v3018_v59 = vsel %vm267_vm1, %v307_v42, %v4299_v55  ;;  %v286_v1 = vrot.slane %v183_v60, 7  ;;  %v229_v2 = vrot.slane %v191_v61, 1  ;;  %2580 = vmatpush.msk.msra.mxu1 %vm496_vm0, %v2579_v37  ;;  %v185_v42 = vld [vmem:[%s2894_s27 + $0x70] sm:$0xff] }
  0x1c   : > { %2421 = vmatmul.msk.f32.gmra.mxu1 %vm415_vm2, %v2940_v29  ;;  %v3030_v63 = vsel %vm267_vm1, %v268_v44, %v269_v56  ;;  %v298_v3 = vrot.slane %v191_v61, 7  ;;  %v233_v5 = vrot.slane %v199_v62, 1  ;;  %v310_v6 = vrot.slane %v199_v62, 7  ;;  %v193_v44 = vld [vmem:[%s2894_s27 + $0xb0] sm:$0xff] }
  0x1d   : > { %2429 = vmatmul.msk.f32.gmra.mxu2 %vm415_vm2, %v2945_v30  ;;  %v221_v7 = vrot.slane %v175_v4, 1  ;;  %v274_v8 = vrot.slane %v175_v4, 7  ;;  %v3038_v9 = vsel %vm267_vm1, %v225_v0, %v286_v1  ;;  %v4307_v19 = vrot.slane %v3044_v11, 7  ;;  %v201_v60 = vld [vmem:[%s2894_s27 + $0xf0] sm:$0xff]  ;;  %v2681_v4 = vld [vmem:[%s4295_s1 + $0x20] sm:$0xf] }
  0x1e   : > { %2437 = vmatmul.msk.f32.gmra.mxu3 %vm415_vm2, %v2950_v31  ;;  %4342 = vst [vmem:[#allocation6_spill] sm:$0xff] %v3038_v9  ;;  %v3041_v10 = vsel %vm267_vm1, %v229_v2, %v298_v3  ;;  %v3047_v12 = vsel %vm267_vm1, %v233_v5, %v310_v6  ;;  %v4303_v33 = vrot.slane %v3050_v13, 7  ;;  %v4298_v38 = vrot.slane %v3053_v16, 7  ;;  %2682 = vmatpush.msk.msra.mxu0 %vm496_vm0, %v2681_v4  ;;  %v3151_v4 = vld [vmem:[%s2894_s27 + $0x38] sm:$0xff] }
  0x1f   : > { %2413 = vmatmul.msk.f32.gmra.mxu0 %vm415_vm2, %v2962_v35  ;;  %v3061_v22 = vsel %vm267_vm1, %v221_v7, %v274_v8  ;;  %v275_v39 = vrot.slane %v3070_v34, 7  ;;  %v3088_v40 = vsel %vm267_vm1, %v286_v1, %v4307_v19  ;;  %v226_v61 = vrot.slane %v185_v42, 1 }
  0x20   : > { %4343 = vst [vmem:[#allocation7_spill] sm:$0xff] %v3061_v22  ;;  %v3093_v41 = vsel %vm267_vm1, %v298_v3, %v4303_v33  ;;  %v3099_v43 = vsel %vm267_vm1, %v310_v6, %v4298_v38  ;;  %v289_v0 = vrot.slane %v185_v42, 7  ;;  %v230_v1 = vrot.slane %v193_v44, 1  ;;  %v177_v3 = vld [vmem:[%s2894_s27 + $0x30] sm:$0xff]  ;;  %v3131_v42 = vld [vmem:[%s2894_s27 + $0x78] sm:$0xff] }
  0x21   : > { %4344 = vst [vmem:[#allocation8_spill] sm:$0xff] %v3088_v40  ;;  %v3110_v62 = vsel %vm267_vm1, %v274_v8, %v275_v39  ;;  %v301_v2 = vrot.slane %v193_v44, 7  ;;  %v234_v5 = vrot.slane %v201_v60, 1  ;;  %v313_v6 = vrot.slane %v201_v60, 7  ;;  %v3134_v44 = vld [vmem:[%s2894_s27 + $0xb8] sm:$0xff] }
  0x22   : > { %4345 = vst [vmem:[#allocation9_spill] sm:$0xff] %v3110_v62  ;;  %v222_v7 = vrot.slane %v177_v3, 1  ;;  %v277_v8 = vrot.slane %v177_v3, 7  ;;  %v3122_v32 = vsel %vm267_vm1, %v226_v61, %v289_v0  ;;  %v3137_v60 = vld [vmem:[%s2894_s27 + $0xf8] sm:$0xff]  ;;  %v4301_v3 = vrot.slane %v3134_v44, 7 }
  0x23   : > { %4346 = vst [vmem:[#allocation10_spill] sm:$0xff] %v3122_v32  ;;  %v3125_v36 = vsel %vm267_vm1, %v230_v1, %v301_v2  ;;  %v3128_v37 = vsel %vm267_vm1, %v234_v5, %v313_v6  ;;  %v4306_v1 = vrot.slane %v3131_v42, 7  ;;  %v4302_v5 = vrot.slane %v3137_v60, 7 }
  0x24   : > { %2422 = vmatmul.msk.f32.gmra.mxu1 %vm415_vm2, %v2970_v45  ;;  %v3144_v61 = vsel %vm267_vm1, %v222_v7, %v277_v8  ;;  %v278_v38 = vrot.slane %v3151_v4, 7  ;;  %v3165_v55 = vsel %vm267_vm1, %v301_v2, %v4301_v3  ;;  %v896_v2 = vrot.slane %v2992_v51, 1 }
  0x25   : > { %2430 = vmatmul.msk.f32.gmra.mxu2 %vm415_vm2, %v2973_v46  ;;  %4347 = vst [vmem:[#allocation11_spill] sm:$0xff] %v3144_v61  ;;  %v3160_v7 = vsel %vm267_vm1, %v289_v0, %v4306_v1  ;;  %v3170_v27 = vsel %vm267_vm1, %v313_v6, %v4302_v5  ;;  %v897_v3 = vrot.slane %v3030_v63, 1  ;;  %v348_v6 = vrot.slane %v2999_v54, 5 }
  0x26   : > { %2438 = vmatmul.msk.f32.gmra.mxu3 %vm415_vm2, %v2976_v47  ;;  %v3179_v0 = vsel %vm267_vm1, %v277_v8, %v278_v38  ;;  %v901_v5 = vrot.slane %v2931_v26, 1  ;;  %v902_v33 = vrot.slane %v2962_v35, 1  ;;  %v349_v8 = vrot.slane %v2928_v25, 5 }
  0x27   : > { %2414 = vmatmul.msk.f32.gmra.mxu0 %vm415_vm2, %v2992_v51  ;;  %4348 = vst [vmem:[#allocation12_spill] sm:$0xff] %v3179_v0  ;;  %v3192_v53 = vsel %vm895_vm3, %v896_v2, %v897_v3  ;;  %v3197_v24 = vsel %vm267_vm1, %v269_v56, %v348_v6 }
  0x28   : > { %v903_v1 = vsel %vm895_vm3, %v901_v5, %v902_v33  ;;  %v3209_v2 = vsel %vm267_vm1, %v272_v28, %v349_v8  ;;  %v899_v54 = vrot.slane %v3197_v24, 1  ;;  %v906_v28 = vrot.slane %v3061_v22, 1 }
  0x29   : > { %4349 = vst [vmem:[#allocation13_spill] sm:$0xff] %v3209_v2  ;;  %v904_v56 = vrot.slane %v3209_v2, 1 }
  0x2a   : > { %v3215_v6 = vsel %vm895_vm3, %v897_v3, %v899_v54 }
  0x2b   : > { %4350 = vst [vmem:[#allocation14_spill] sm:$0xff] %v3215_v6  ;;  %v905_v25 = vsel %vm895_vm3, %v902_v33, %v904_v56  ;;  %v907_v33 = vrot.slane %v3110_v62, 1  ;;  %v351_v56 = vrot.slane %v3151_v4, 5  ;;  %v917_v4 = vrot.slane %v2940_v29, 1 }
  0x2c   : > { %2423 = vmatmul.msk.f32.gmra.mxu1 %vm415_vm2, %v3008_v57 }
  0x2d   : > { %2431 = vmatmul.msk.f32.gmra.mxu2 %vm415_vm2, %v3013_v58  ;;  %v3247_v3 = vsel %vm895_vm3, %v906_v28, %v907_v33  ;;  %v3285_v28 = vsel %vm267_vm1, %v278_v38, %v351_v56  ;;  %v916_v38 = vrot.slane %v2908_v17, 1 }
  0x2e   : > { %2439 = vmatmul.msk.f32.gmra.mxu3 %vm415_vm2, %v3018_v59  ;;  %4351 = vst [vmem:[#allocation15_spill] sm:$0xff] %v3247_v3 }
  0x2f   : > { %2415 = vmatmul.msk.f32.gmra.mxu0 %vm415_vm2, %v3030_v63  ;;  %4355 = vst [vmem:[#allocation19_spill] sm:$0xff] %v3285_v28  ;;  %v3313_v56 = vsel %vm895_vm3, %v916_v38, %v917_v4 }
  0x30   : > { %4357 = vst [vmem:[#allocation21_spill] sm:$0xff] %v3313_v56 }
  0x34   : > { %2424 = vmatmul.msk.f32.gmra.mxu1 %vm415_vm2, %v3038_v9 }
  0x35   : > { %2432 = vmatmul.msk.f32.gmra.mxu2 %vm415_vm2, %v3041_v10 }
  0x36   : > { %2440 = vmatmul.msk.f32.gmra.mxu3 %vm415_vm2, %v3047_v12 }
  0x37   : > { %2416 = vmatmul.msk.f32.gmra.mxu0 %vm415_vm2, %v3061_v22 }
  0x3c   : > { %2425 = vmatmul.msk.f32.gmra.mxu1 %vm415_vm2, %v3088_v40 }
  0x3d   : > { %2433 = vmatmul.msk.f32.gmra.mxu2 %vm415_vm2, %v3093_v41 }
  0x3e   : > { %2441 = vmatmul.msk.f32.gmra.mxu3 %vm415_vm2, %v3099_v43 }
  0x3f   : > { %2417 = vmatmul.msk.f32.gmra.mxu0 %vm415_vm2, %v3110_v62 }
  0x44   : > { %2426 = vmatmul.msk.f32.gmra.mxu1 %vm415_vm2, %v3122_v32 }
  0x45   : > { %2434 = vmatmul.msk.f32.gmra.mxu2 %vm415_vm2, %v3125_v36 }
  0x46   : > { %2442 = vmatmul.msk.f32.gmra.mxu3 %vm415_vm2, %v3128_v37 }
  0x47   : > { %2418 = vmatmul.msk.f32.gmra.mxu0 %vm415_vm2, %v3144_v61 }
  0x4c   : > { %2427 = vmatmul.msk.f32.gmra.mxu1 %vm415_vm2, %v3160_v7 }
  0x4d   : > { %2435 = vmatmul.msk.f32.gmra.mxu2 %vm415_vm2, %v3165_v55 }
  0x4e   : > { %2443 = vmatmul.msk.f32.gmra.mxu3 %vm415_vm2, %v3170_v27 }
  0x4f   : > { %2419 = vmatmul.msk.f32.gmra.mxu0 %vm415_vm2, %v3179_v0 }
  0x54   : > { %2445 = vmatmul.msk.f32.vlgmr.msrb.gmra.mxu1 %vm415_vm2, %v2992_v51 }
  0x55   : > { %2479 = vmatmul.msk.f32.vlgmr.msrb.gmra.mxu2 %vm415_vm2, %v2992_v51 }
  0x56   : > { %2513 = vmatmul.msk.f32.vlgmr.msrb.gmra.mxu3 %vm415_vm2, %v3192_v53 }
  0x57   : > { %2547 = vmatmul.msk.f32.vlgmr.msrb.gmra.mxu0 %vm415_vm2, %v903_v1 }
  0x5c   : > { %2446 = vmatmul.msk.f32.gmra.mxu1 %vm415_vm2, %v3030_v63 }
  0x5d   : > { %2480 = vmatmul.msk.f32.gmra.mxu2 %vm415_vm2, %v3030_v63 }
  0x5e   : > { %2514 = vmatmul.msk.f32.gmra.mxu3 %vm415_vm2, %v3215_v6 }
  0x5f   : > { %2548 = vmatmul.msk.f32.gmra.mxu0 %vm415_vm2, %v905_v25 }
  0x64   : > { %2447 = vmatmul.msk.f32.gmra.mxu1 %vm415_vm2, %v2931_v26 }
  0x65   : > { %2481 = vmatmul.msk.f32.gmra.mxu2 %vm415_vm2, %v3061_v22 }
  0x66   : > { %2515 = vmatmul.msk.f32.gmra.mxu3 %vm415_vm2, %v903_v1  ;;  %v350_v1 = vrot.slane %v3070_v34, 5  ;;  %v911_v34 = vrot.slane %v3144_v61, 1 }
  0x67   : > { %2549 = vmatmul.msk.f32.gmra.mxu0 %vm415_vm2, %v3192_v53 }
  0x68   : > { %v3254_v5 = vsel %vm267_vm1, %v275_v39, %v350_v1  ;;  %v912_v39 = vrot.slane %v3179_v0, 1 }
  0x69   : > { %4352 = vst [vmem:[#allocation16_spill] sm:$0xff] %v3254_v5  ;;  %v909_v8 = vrot.slane %v3254_v5, 1 }
  0x6b   : > { %v3264_v54 = vsel %vm895_vm3, %v907_v33, %v909_v8  ;;  %v914_v33 = vrot.slane %v3285_v28, 1 }
  0x6c   : > { %2448 = vmatmul.msk.f32.gmra.mxu1 %vm415_vm2, %v2962_v35  ;;  %4353 = vst [vmem:[#allocation17_spill] sm:$0xff] %v3264_v54 }
  0x6d   : > { %2482 = vmatmul.msk.f32.gmra.mxu2 %vm415_vm2, %v3110_v62  ;;  %v3295_v1 = vsel %vm895_vm3, %v912_v39, %v914_v33 }
  0x6e   : > { %2516 = vmatmul.msk.f32.gmra.mxu3 %vm415_vm2, %v905_v25  ;;  %v3278_v25 = vsel %vm895_vm3, %v911_v34, %v912_v39  ;;  %4356 = vst [vmem:[#allocation20_spill] sm:$0xff] %v3295_v1  ;;  %v352_v34 = vrot.slane %v2901_v14, 5 }
  0x6f   : > { %2550 = vmatmul.msk.f32.gmra.mxu0 %vm415_vm2, %v3215_v6  ;;  %4354 = vst [vmem:[#allocation18_spill] sm:$0xff] %v3278_v25 }
  0x70   : > { %v3320_v33 = vsel %vm267_vm1, %v281_v23, %v352_v34 }
  0x71   : > { %4358 = vst [vmem:[#allocation22_spill] sm:$0xff] %v3320_v33  ;;  %v919_v28 = vrot.slane %v3320_v33, 1  ;;  %v922_v33 = vrot.slane %v3008_v57, 1 }
  0x73   : > { %v3338_v23 = vsel %vm895_vm3, %v917_v4, %v919_v28 }
  0x74   : > { %2449 = vmatmul.msk.f32.gmra.mxu1 %vm415_vm2, %v2992_v51  ;;  %4361 = vst [vmem:[#allocation25_spill] sm:$0xff] %v3338_v23 }
  0x75   : > { %2483 = vmatmul.msk.f32.gmra.mxu2 %vm415_vm2, %v3144_v61 }
  0x76   : > { %2517 = vmatmul.msk.f32.gmra.mxu3 %vm415_vm2, %v3192_v53 }
  0x77   : > { %2551 = vmatmul.msk.f32.gmra.mxu0 %vm415_vm2, %v3247_v3 }
  0x7c   : > { %2450 = vmatmul.msk.f32.gmra.mxu1 %vm415_vm2, %v3030_v63 }
  0x7d   : > { %2484 = vmatmul.msk.f32.gmra.mxu2 %vm415_vm2, %v3179_v0 }
  0x7e   : > { %2518 = vmatmul.msk.f32.gmra.mxu3 %vm415_vm2, %v3215_v6 }
  0x7f   : > { %2552 = vmatmul.msk.f32.gmra.mxu0 %vm415_vm2, %v3264_v54 }
  0x84   : > { %2451 = vmatmul.msk.f32.gmra.mxu1 %vm415_vm2, %v3061_v22 }
  0x85   : > { %2485 = vmatmul.msk.f32.gmra.mxu2 %vm415_vm2, %v2908_v17 }
  0x86   : > { %2519 = vmatmul.msk.f32.gmra.mxu3 %vm415_vm2, %v3247_v3 }
  0x87   : > { %2553 = vmatmul.msk.f32.gmra.mxu0 %vm415_vm2, %v3278_v25 }
  0x8c   : > { %2452 = vmatmul.msk.f32.gmra.mxu1 %vm415_vm2, %v3110_v62 }
  0x8d   : > { %2486 = vmatmul.msk.f32.gmra.mxu2 %vm415_vm2, %v2940_v29 }
  0x8e   : > { %2520 = vmatmul.msk.f32.gmra.mxu3 %vm415_vm2, %v3264_v54 }
  0x8f   : > { %2554 = vmatmul.msk.f32.gmra.mxu0 %vm415_vm2, %v3295_v1 }
  0x91   : > { %v3303_v8 = vpop.f32.mrf.mxu1 }
  0x94   : > { %2453 = vmatmul.msk.f32.gmra.mxu1 %vm415_vm2, %v3144_v61  ;;  %v3310_v39 = vpop.f32.mrf.mxu0 }
  0x95   : > { %2487 = vmatmul.msk.f32.gmra.mxu2 %vm415_vm2, %v2970_v45 }
  0x96   : > { %2521 = vmatmul.msk.f32.gmra.mxu3 %vm415_vm2, %v3278_v25 }
  0x97   : > { %2555 = vmatmul.msk.f32.gmra.mxu0 %vm415_vm2, %v3313_v56 }
  0x98   : > { %v3322_v19 = vpop.f32.mrf.mxu2 }
  0x99   : > { %4359 = vst [vmem:[#allocation23_spill] sm:$0xff] %v3322_v19  ;;  %v3326_v52 = vpop.f32.mrf.mxu3  ;;  %v3329_v61 = vpop.f32.mrf.mxu1 }
  0x9a   : > { %4360 = vst [vmem:[#allocation24_spill] sm:$0xff] %v3326_v52  ;;  %v921_v52 = vrot.slane %v2970_v45, 1 }
  0x9c   : > { %2454 = vmatmul.msk.f32.gmra.mxu1 %vm415_vm2, %v3179_v0  ;;  %v3335_v14 = vpop.f32.mrf.mxu0  ;;  %v353_v0 = vrot.slane %v2979_v48, 5  ;;  %v3360_v4 = vsel %vm895_vm3, %v921_v52, %v922_v33 }
  0x9d   : > { %2488 = vmatmul.msk.f32.gmra.mxu2 %vm415_vm2, %v3008_v57  ;;  %4364 = vst [vmem:[#allocation28_spill] sm:$0xff] %v3360_v4 }
  0x9e   : > { %2522 = vmatmul.msk.f32.gmra.mxu3 %vm415_vm2, %v3295_v1 }
  0x9f   : > { %2556 = vmatmul.msk.f32.gmra.mxu0 %vm415_vm2, %v3338_v23 }
  0xa0   : > { %v3342_v38 = vpop.f32.mrf.mxu2 }
  0xa1   : > { %4362 = vst [vmem:[#allocation26_spill] sm:$0xff] %v3342_v38  ;;  %v3346_v34 = vpop.f32.mrf.mxu3  ;;  %v3350_v25 = vpop.f32.mrf.mxu1 }
  0xa2   : > { %4363 = vst [vmem:[#allocation27_spill] sm:$0xff] %v3346_v34  ;;  %v4365_v34 = vrot.slane %v2979_v48, 7 }
  0xa4   : > { %2455 = vmatmul.msk.f32.gmra.mxu1 %vm415_vm2, %v2908_v17  ;;  %v3357_v28 = vpop.f32.mrf.mxu0  ;;  %v3367_v1 = vsel %vm267_vm1, %v4365_v34, %v353_v0 }
  0xa5   : > { %2489 = vmatmul.msk.f32.gmra.mxu2 %vm415_vm2, %v3038_v9  ;;  %4366 = vst [vmem:[#allocation29_spill] sm:$0xff] %v3367_v1  ;;  %v924_v5 = vrot.slane %v3367_v1, 1  ;;  %v927_v1 = vrot.slane %v3088_v40, 1 }
  0xa6   : > { %2523 = vmatmul.msk.f32.gmra.mxu3 %vm415_vm2, %v3313_v56 }
  0xa7   : > { %2557 = vmatmul.msk.f32.gmra.mxu0 %vm415_vm2, %v3360_v4  ;;  %v3385_v52 = vsel %vm895_vm3, %v922_v33, %v924_v5 }
  0xa8   : > { %v3369_v54 = vpop.f32.mrf.mxu2  ;;  %4369 = vst [vmem:[#allocation32_spill] sm:$0xff] %v3385_v52 }
  0xa9   : > { %4367 = vst [vmem:[#allocation30_spill] sm:$0xff] %v3369_v54  ;;  %v3373_v17 = vpop.f32.mrf.mxu3  ;;  %v3376_v3 = vpop.f32.mrf.mxu1 }
  0xaa   : > { %4368 = vst [vmem:[#allocation31_spill] sm:$0xff] %v3373_v17  ;;  %v926_v17 = vrot.slane %v3038_v9, 1 }
  0xac   : > { %2456 = vmatmul.msk.f32.gmra.mxu1 %vm415_vm2, %v2940_v29  ;;  %v3382_v48 = vpop.f32.mrf.mxu0  ;;  %v354_v29 = vrot.slane %v3044_v11, 5  ;;  %v3407_v33 = vsel %vm895_vm3, %v926_v17, %v927_v1 }
  0xad   : > { %2490 = vmatmul.msk.f32.gmra.mxu2 %vm415_vm2, %v3088_v40  ;;  %4372 = vst [vmem:[#allocation35_spill] sm:$0xff] %v3407_v33 }
  0xae   : > { %2524 = vmatmul.msk.f32.gmra.mxu3 %vm415_vm2, %v3338_v23 }
  0xaf   : > { %2558 = vmatmul.msk.f32.gmra.mxu0 %vm415_vm2, %v3385_v52 }
  0xb0   : > { %v3389_v0 = vpop.f32.mrf.mxu2 }
  0xb1   : > { %4370 = vst [vmem:[#allocation33_spill] sm:$0xff] %v3389_v0  ;;  %v3393_v34 = vpop.f32.mrf.mxu3  ;;  %v3397_v56 = vpop.f32.mrf.mxu1 }
  0xb2   : > { %4371 = vst [vmem:[#allocation34_spill] sm:$0xff] %v3393_v34  ;;  %v4373_v34 = vrot.slane %v3044_v11, 7 }
  0xb4   : > { %2457 = vmatmul.msk.f32.gmra.mxu1 %vm415_vm2, %v2970_v45  ;;  %v3404_v5 = vpop.f32.mrf.mxu0  ;;  %v3414_v23 = vsel %vm267_vm1, %v4373_v34, %v354_v29 }
  0xb5   : > { %2491 = vmatmul.msk.f32.gmra.mxu2 %vm415_vm2, %v3122_v32  ;;  %4374 = vst [vmem:[#allocation36_spill] sm:$0xff] %v3414_v23  ;;  %v929_v54 = vrot.slane %v3414_v23, 1  ;;  %v932_v23 = vrot.slane %v3160_v7, 1 }
  0xb6   : > { %2525 = vmatmul.msk.f32.gmra.mxu3 %vm415_vm2, %v3360_v4 }
  0xb7   : > { %2559 = vmatmul.msk.f32.gmra.mxu0 %vm415_vm2, %v3407_v33  ;;  %v3432_v29 = vsel %vm895_vm3, %v927_v1, %v929_v54 }
  0xb8   : > { %v3416_v0 = vpop.f32.mrf.mxu2  ;;  %4377 = vst [vmem:[#allocation39_spill] sm:$0xff] %v3432_v29 }
  0xb9   : > { %4375 = vst [vmem:[#allocation37_spill] sm:$0xff] %v3416_v0  ;;  %v3420_v45 = vpop.f32.mrf.mxu3  ;;  %v3423_v62 = vpop.f32.mrf.mxu1 }
  0xba   : > { %4376 = vst [vmem:[#allocation38_spill] sm:$0xff] %v3420_v45  ;;  %v931_v45 = vrot.slane %v3122_v32, 1 }
  0xbc   : > { %2458 = vmatmul.msk.f32.gmra.mxu1 %vm415_vm2, %v3008_v57  ;;  %v3429_v17 = vpop.f32.mrf.mxu0  ;;  %v355_v57 = vrot.slane %v3131_v42, 5  ;;  %v3454_v1 = vsel %vm895_vm3, %v931_v45, %v932_v23 }
  0xbd   : > { %2492 = vmatmul.msk.f32.gmra.mxu2 %vm415_vm2, %v3160_v7 }
  0xbe   : > { %2526 = vmatmul.msk.f32.gmra.mxu3 %vm415_vm2, %v3385_v52 }
  0xbf   : > { %2560 = vmatmul.msk.f32.gmra.mxu0 %vm415_vm2, %v3432_v29 }
  0xc0   : > { %v3436_v11 = vpop.f32.mrf.mxu2 }
  0xc1   : > { %4378 = vst [vmem:[#allocation40_spill] sm:$0xff] %v3436_v11  ;;  %v3440_v34 = vpop.f32.mrf.mxu3  ;;  %v3444_v4 = vpop.f32.mrf.mxu1 }
  0xc2   : > { %4379 = vst [vmem:[#allocation41_spill] sm:$0xff] %v3440_v34  ;;  %v4380_v34 = vrot.slane %v3131_v42, 7 }
  0xc4   : > { %2459 = vmatmul.msk.f32.gmra.mxu1 %vm415_vm2, %v3038_v9  ;;  %v3451_v54 = vpop.f32.mrf.mxu0  ;;  %v3461_v52 = vsel %vm267_vm1, %v4380_v34, %v355_v57 }
  0xc5   : > { %2493 = vmatmul.msk.f32.gmra.mxu2 %vm415_vm2, %v2911_v18  ;;  %4381 = vst [vmem:[#allocation42_spill] sm:$0xff] %v3461_v52  ;;  %v934_v0 = vrot.slane %v3461_v52, 1  ;;  %v937_v52 = vrot.slane %v2945_v30, 1 }
  0xc6   : > { %2527 = vmatmul.msk.f32.gmra.mxu3 %vm415_vm2, %v3407_v33  ;;  %v356_v33 = vrot.slane %v2904_v15, 5 }
  0xc7   : > { %2561 = vmatmul.msk.f32.gmra.mxu0 %vm415_vm2, %v3454_v1  ;;  %v3479_v57 = vsel %vm895_vm3, %v932_v23, %v934_v0 }
  0xc8   : > { %v3463_v11 = vpop.f32.mrf.mxu2 }
  0xc9   : > { %4382 = vst [vmem:[#allocation43_spill] sm:$0xff] %v3463_v11  ;;  %v3467_v9 = vpop.f32.mrf.mxu3  ;;  %v3470_v22 = vpop.f32.mrf.mxu1 }
  0xca   : > { %4383 = vst [vmem:[#allocation44_spill] sm:$0xff] %v3467_v9  ;;  %v936_v9 = vrot.slane %v2911_v18, 1 }
  0xcc   : > { %2460 = vmatmul.msk.f32.gmra.mxu1 %vm415_vm2, %v3088_v40  ;;  %v3476_v45 = vpop.f32.mrf.mxu0  ;;  %v3497_v0 = vsel %vm895_vm3, %v936_v9, %v937_v52 }
  0xcd   : > { %2494 = vmatmul.msk.f32.gmra.mxu2 %vm415_vm2, %v2945_v30 }
  0xce   : > { %2528 = vmatmul.msk.f32.gmra.mxu3 %vm415_vm2, %v3432_v29 }
  0xcf   : > { %2562 = vmatmul.msk.f32.gmra.mxu0 %vm415_vm2, %v3479_v57 }
  0xd0   : > { %v3483_v42 = vpop.f32.mrf.mxu2 }
  0xd1   : > { %4384 = vst [vmem:[#allocation45_spill] sm:$0xff] %v3483_v42  ;;  %v3487_v34 = vpop.f32.mrf.mxu3  ;;  %v633_v40 = vpop.f32.mrf.mxu1 }
  0xd2   : > { %4385 = vst [vmem:[#allocation46_spill] sm:$0xff] %v3487_v34  ;;  %v4386_v34 = vrot.slane %v2904_v15, 7  ;;  %v634_v42 = vadd.f32 %v633_v40, %v3310_v39 }
  0xd4   : > { %2461 = vmatmul.msk.f32.gmra.mxu1 %vm415_vm2, %v3122_v32  ;;  %v1212_v23 = vpop.f32.mrf.mxu0  ;;  %v3504_v29 = vsel %vm267_vm1, %v4386_v34, %v356_v33 }
  0xd5   : > { %2495 = vmatmul.msk.f32.gmra.mxu2 %vm415_vm2, %v2973_v46  ;;  %v939_v6 = vrot.slane %v3504_v29, 1 }
  0xd6   : > { %2529 = vmatmul.msk.f32.gmra.mxu3 %vm415_vm2, %v3454_v1 }
  0xd7   : > { %2563 = vmatmul.msk.f32.gmra.mxu0 %vm415_vm2, %v3497_v0  ;;  %v3517_v40 = vsel %vm895_vm3, %v937_v52, %v939_v6 }
  0xd8   : > { %v751_v11 = vpop.f32.mrf.mxu2 }
  0xd9   : > { %v847_v32 = vadd.f32 %v751_v11, %v634_v42  ;;  %v1058_v38 = vpop.f32.mrf.mxu3  ;;  %v636_v9 = vpop.f32.mrf.mxu1  ;;  %v942_v11 = vrot.slane %v3013_v58, 1  ;;  %v357_v42 = vrot.slane %v2982_v49, 5 }
  0xda   : > { %v637_v39 = vadd.f32 %v636_v9, %v3335_v14  ;;  %v4389_v9 = vrot.slane %v2982_v49, 7 }
  0xdb   : > { %v1154_v2 = vadd.f32 %v1058_v38, %v847_v32  ;;  %v941_v38 = vrot.slane %v2973_v46, 1 }
  0xdc   : > { %2462 = vmatmul.msk.f32.gmra.mxu1 %vm415_vm2, %v3160_v7  ;;  %v1215_v15 = vpop.f32.mrf.mxu0 }
  0xdd   : > { %v3510_v19 = vadd.f32 %v1212_v23, %v1154_v2  ;;  %2496 = vmatmul.msk.f32.gmra.mxu2 %vm415_vm2, %v3013_v58  ;;  %v3534_v23 = vsel %vm895_vm3, %v941_v38, %v942_v11 }
  0xde   : > { %2530 = vmatmul.msk.f32.gmra.mxu3 %vm415_vm2, %v3479_v57 }
  0xdf   : > { %4387 = vst [vmem:[#allocation47_spill] sm:$0xff] %v3510_v19  ;;  %2564 = vmatmul.msk.f32.gmra.mxu0 %vm415_vm2, %v3517_v40 }
  0xe0   : > { %v754_v33 = vpop.f32.mrf.mxu2 }
  0xe1   : > { %v848_v32 = vadd.f32 %v754_v33, %v637_v39  ;;  %v1061_v2 = vpop.f32.mrf.mxu3  ;;  %v639_v34 = vpop.f32.mrf.mxu1  ;;  %v3541_v39 = vsel %vm267_vm1, %v4389_v9, %v357_v42  ;;  %v946_v9 = vrot.slane %v3041_v10, 1 }
  0xe3   : > { %v1155_v6 = vadd.f32 %v1061_v2, %v848_v32 }
  0xe4   : > { %2463 = vmatmul.msk.f32.gmra.mxu1 %vm415_vm2, %v2911_v18  ;;  %v1218_v14 = vpop.f32.mrf.mxu0 }
  0xe5   : > { %v3527_v52 = vadd.f32 %v1215_v15, %v1155_v6  ;;  %2497 = vmatmul.msk.f32.gmra.mxu2 %vm415_vm2, %v3041_v10  ;;  %v640_v15 = vadd.f32 %v639_v34, %v3357_v28  ;;  %v944_v6 = vrot.slane %v3541_v39, 1 }
  0xe6   : > { %2531 = vmatmul.msk.f32.gmra.mxu3 %vm415_vm2, %v3497_v0 }
  0xe7   : > { %4388 = vst [vmem:[#allocation48_spill] sm:$0xff] %v3527_v52  ;;  %2565 = vmatmul.msk.f32.gmra.mxu0 %vm415_vm2, %v3534_v23  ;;  %v3554_v28 = vsel %vm895_vm3, %v942_v11, %v944_v6 }
  0xe8   : > { %v757_v33 = vpop.f32.mrf.mxu2 }
  0xe9   : > { %v849_v32 = vadd.f32 %v757_v33, %v640_v15  ;;  %v1064_v2 = vpop.f32.mrf.mxu3  ;;  %v642_v38 = vpop.f32.mrf.mxu1  ;;  %v947_v15 = vrot.slane %v3093_v41, 1  ;;  %v358_v33 = vrot.slane %v3050_v13, 5 }
  0xea   : > { %v643_v42 = vadd.f32 %v642_v38, %v3382_v48  ;;  %v4392_v38 = vrot.slane %v3050_v13, 7 }
  0xeb   : > { %v1156_v52 = vadd.f32 %v1064_v2, %v849_v32  ;;  %v3571_v6 = vsel %vm895_vm3, %v946_v9, %v947_v15 }
  0xec   : > { %2464 = vmatmul.msk.f32.gmra.mxu1 %vm415_vm2, %v2945_v30  ;;  %v1221_v49 = vpop.f32.mrf.mxu0 }
  0xed   : > { %v3547_v19 = vadd.f32 %v1218_v14, %v1156_v52  ;;  %2498 = vmatmul.msk.f32.gmra.mxu2 %vm415_vm2, %v3093_v41 }
  0xee   : > { %2532 = vmatmul.msk.f32.gmra.mxu3 %vm415_vm2, %v3517_v40 }
  0xef   : > { %4390 = vst [vmem:[#allocation49_spill] sm:$0xff] %v3547_v19  ;;  %2566 = vmatmul.msk.f32.gmra.mxu0 %vm415_vm2, %v3554_v28 }
  0xf0   : > { %v760_v34 = vpop.f32.mrf.mxu2 }
  0xf1   : > { %v850_v52 = vadd.f32 %v760_v34, %v643_v42  ;;  %v1067_v14 = vpop.f32.mrf.mxu3  ;;  %v645_v32 = vpop.f32.mrf.mxu1  ;;  %v3578_v42 = vsel %vm267_vm1, %v4392_v38, %v358_v33  ;;  %v951_v38 = vrot.slane %v3125_v36, 1 }
  0xf3   : > { %v1157_v11 = vadd.f32 %v1067_v14, %v850_v52 }
  0xf4   : > { %2465 = vmatmul.msk.f32.gmra.mxu1 %vm415_vm2, %v2973_v46  ;;  %v1224_v48 = vpop.f32.mrf.mxu0 }
  0xf5   : > { %v3564_v2 = vadd.f32 %v1221_v49, %v1157_v11  ;;  %2499 = vmatmul.msk.f32.gmra.mxu2 %vm415_vm2, %v3125_v36  ;;  %v646_v49 = vadd.f32 %v645_v32, %v3404_v5  ;;  %v949_v11 = vrot.slane %v3578_v42, 1 }
  0xf6   : > { %2533 = vmatmul.msk.f32.gmra.mxu3 %vm415_vm2, %v3534_v23 }
  0xf7   : > { %4391 = vst [vmem:[#allocation50_spill] sm:$0xff] %v3564_v2  ;;  %2567 = vmatmul.msk.f32.gmra.mxu0 %vm415_vm2, %v3571_v6  ;;  %v3591_v5 = vsel %vm895_vm3, %v947_v15, %v949_v11 }
  0xf8   : > { %v763_v34 = vpop.f32.mrf.mxu2 }
  0xf9   : > { %v851_v52 = vadd.f32 %v763_v34, %v646_v49  ;;  %v1070_v14 = vpop.f32.mrf.mxu3  ;;  %v648_v9 = vpop.f32.mrf.mxu1  ;;  %v952_v49 = vrot.slane %v3165_v55, 1  ;;  %v359_v34 = vrot.slane %v3134_v44, 5 }
  0xfa   : > { %v649_v33 = vadd.f32 %v648_v9, %v3429_v17  ;;  %v4395_v9 = vrot.slane %v3134_v44, 7 }
  0xfb   : > { %v1158_v2 = vadd.f32 %v1070_v14, %v851_v52  ;;  %v3608_v11 = vsel %vm895_vm3, %v951_v38, %v952_v49 }
  0xfc   : > { %2466 = vmatmul.msk.f32.gmra.mxu1 %vm415_vm2, %v3013_v58  ;;  %v1227_v13 = vpop.f32.mrf.mxu0 }
  0xfd   : > { %v3584_v19 = vadd.f32 %v1224_v48, %v1158_v2  ;;  %2500 = vmatmul.msk.f32.gmra.mxu2 %vm415_vm2, %v3165_v55 }
  0xfe   : > { %2534 = vmatmul.msk.f32.gmra.mxu3 %vm415_vm2, %v3554_v28 }
  0xff   : > { %4393 = vst [vmem:[#allocation51_spill] sm:$0xff] %v3584_v19  ;;  %2568 = vmatmul.msk.f32.gmra.mxu0 %vm415_vm2, %v3591_v5 }
 0x100   : > { %v766_v32 = vpop.f32.mrf.mxu2 }
 0x101   : > { %v852_v2 = vadd.f32 %v766_v32, %v649_v33  ;;  %v1073_v48 = vpop.f32.mrf.mxu3  ;;  %v651_v52 = vpop.f32.mrf.mxu1  ;;  %v3615_v33 = vsel %vm267_vm1, %v4395_v9, %v359_v34  ;;  %v956_v9 = vrot.slane %v2921_v21, 1 }
 0x103   : > { %v1159_v15 = vadd.f32 %v1073_v48, %v852_v2 }
 0x104   : > { %2467 = vmatmul.msk.f32.gmra.mxu1 %vm415_vm2, %v3041_v10  ;;  %v1230_v17 = vpop.f32.mrf.mxu0 }
 0x105   : > { %v3601_v14 = vadd.f32 %v1227_v13, %v1159_v15  ;;  %2501 = vmatmul.msk.f32.gmra.mxu2 %vm415_vm2, %v2921_v21  ;;  %v652_v13 = vadd.f32 %v651_v52, %v3451_v54  ;;  %v954_v15 = vrot.slane %v3615_v33, 1 }
 0x106   : > { %2535 = vmatmul.msk.f32.gmra.mxu3 %vm415_vm2, %v3571_v6 }
 0x107   : > { %4394 = vst [vmem:[#allocation52_spill] sm:$0xff] %v3601_v14  ;;  %2569 = vmatmul.msk.f32.gmra.mxu0 %vm415_vm2, %v3608_v11  ;;  %v3628_v54 = vsel %vm895_vm3, %v952_v49, %v954_v15 }
 0x108   : > { %v769_v32 = vpop.f32.mrf.mxu2 }
 0x109   : > { %v853_v2 = vadd.f32 %v769_v32, %v652_v13  ;;  %v1076_v48 = vpop.f32.mrf.mxu3  ;;  %v654_v38 = vpop.f32.mrf.mxu1  ;;  %v957_v13 = vrot.slane %v2950_v31, 1  ;;  %v360_v32 = vrot.slane %v2914_v20, 5 }
 0x10a   : > { %v655_v34 = vadd.f32 %v654_v38, %v3476_v45  ;;  %v4398_v38 = vrot.slane %v2914_v20, 7 }
 0x10b   : > { %v1160_v14 = vadd.f32 %v1076_v48, %v853_v2  ;;  %v3645_v15 = vsel %vm895_vm3, %v956_v9, %v957_v13 }
 0x10c   : > { %2468 = vmatmul.msk.f32.gmra.mxu1 %vm415_vm2, %v3093_v41  ;;  %v1233_v44 = vpop.f32.mrf.mxu0 }
 0x10d   : > { %v3621_v19 = vadd.f32 %v1230_v17, %v1160_v14  ;;  %2502 = vmatmul.msk.f32.gmra.mxu2 %vm415_vm2, %v2950_v31 }
 0x10e   : > { %2536 = vmatmul.msk.f32.gmra.mxu3 %vm415_vm2, %v3591_v5 }
 0x10f   : > { %4396 = vst [vmem:[#allocation53_spill] sm:$0xff] %v3621_v19  ;;  %2570 = vmatmul.msk.f32.gmra.mxu0 %vm415_vm2, %v3628_v54 }
 0x110   : > { %v772_v52 = vpop.f32.mrf.mxu2 }
 0x111   : > { %v854_v14 = vadd.f32 %v772_v52, %v655_v34  ;;  %v1079_v17 = vpop.f32.mrf.mxu3  ;;  %v657_v2 = vpop.f32.mrf.mxu1  ;;  %v3652_v34 = vsel %vm267_vm1, %v4398_v38, %v360_v32  ;;  %v961_v38 = vrot.slane %v2976_v47, 1 }
 0x113   : > { %v1161_v49 = vadd.f32 %v1079_v17, %v854_v14 }
 0x114   : > { %2469 = vmatmul.msk.f32.gmra.mxu1 %vm415_vm2, %v3125_v36  ;;  %v1236_v45 = vpop.f32.mrf.mxu0 }
 0x115   : > { %v3638_v48 = vadd.f32 %v1233_v44, %v1161_v49  ;;  %2503 = vmatmul.msk.f32.gmra.mxu2 %vm415_vm2, %v2976_v47  ;;  %v658_v44 = vadd.f32 %v657_v2, %v3303_v8  ;;  %v959_v49 = vrot.slane %v3652_v34, 1 }
 0x116   : > { %2537 = vmatmul.msk.f32.gmra.mxu3 %vm415_vm2, %v3608_v11 }
 0x117   : > { %4397 = vst [vmem:[#allocation54_spill] sm:$0xff] %v3638_v48  ;;  %2571 = vmatmul.msk.f32.gmra.mxu0 %vm415_vm2, %v3645_v15  ;;  %v3665_v8 = vsel %vm895_vm3, %v957_v13, %v959_v49 }
 0x118   : > { %v775_v52 = vpop.f32.mrf.mxu2 }
 0x119   : > { %v855_v14 = vadd.f32 %v775_v52, %v658_v44  ;;  %v1082_v17 = vpop.f32.mrf.mxu3  ;;  %v660_v9 = vpop.f32.mrf.mxu1  ;;  %v962_v44 = vrot.slane %v3018_v59, 1  ;;  %v361_v52 = vrot.slane %v2985_v50, 5 }
 0x11a   : > { %v661_v32 = vadd.f32 %v660_v9, %v3329_v61  ;;  %v4401_v9 = vrot.slane %v2985_v50, 7 }
 0x11b   : > { %v1162_v48 = vadd.f32 %v1082_v17, %v855_v14  ;;  %v3682_v49 = vsel %vm895_vm3, %v961_v38, %v962_v44 }
 0x11c   : > { %2470 = vmatmul.msk.f32.gmra.mxu1 %vm415_vm2, %v3165_v55  ;;  %v1239_v20 = vpop.f32.mrf.mxu0 }
 0x11d   : > { %v3658_v19 = vadd.f32 %v1236_v45, %v1162_v48  ;;  %2504 = vmatmul.msk.f32.gmra.mxu2 %vm415_vm2, %v3018_v59 }
 0x11e   : > { %2538 = vmatmul.msk.f32.gmra.mxu3 %vm415_vm2, %v3628_v54 }
 0x11f   : > { %4399 = vst [vmem:[#allocation55_spill] sm:$0xff] %v3658_v19  ;;  %2572 = vmatmul.msk.f32.gmra.mxu0 %vm415_vm2, %v3665_v8 }
 0x120   : > { %v778_v2 = vpop.f32.mrf.mxu2 }
 0x121   : > { %v856_v48 = vadd.f32 %v778_v2, %v661_v32  ;;  %v1085_v45 = vpop.f32.mrf.mxu3  ;;  %v663_v14 = vpop.f32.mrf.mxu1  ;;  %v3689_v32 = vsel %vm267_vm1, %v4401_v9, %v361_v52  ;;  %v966_v9 = vrot.slane %v3047_v12, 1 }
 0x123   : > { %v1163_v13 = vadd.f32 %v1085_v45, %v856_v48 }
 0x124   : > { %2471 = vmatmul.msk.f32.gmra.mxu1 %vm415_vm2, %v2921_v21  ;;  %v1242_v61 = vpop.f32.mrf.mxu0 }
 0x125   : > { %v3675_v17 = vadd.f32 %v1239_v20, %v1163_v13  ;;  %2505 = vmatmul.msk.f32.gmra.mxu2 %vm415_vm2, %v3047_v12  ;;  %v664_v20 = vadd.f32 %v663_v14, %v3350_v25  ;;  %v964_v13 = vrot.slane %v3689_v32, 1 }
 0x126   : > { %2539 = vmatmul.msk.f32.gmra.mxu3 %vm415_vm2, %v3645_v15 }
 0x127   : > { %4400 = vst [vmem:[#allocation56_spill] sm:$0xff] %v3675_v17  ;;  %2573 = vmatmul.msk.f32.gmra.mxu0 %vm415_vm2, %v3682_v49  ;;  %v3702_v25 = vsel %vm895_vm3, %v962_v44, %v964_v13 }
 0x128   : > { %v781_v2 = vpop.f32.mrf.mxu2 }
 0x129   : > { %v857_v48 = vadd.f32 %v781_v2, %v664_v20  ;;  %v1088_v45 = vpop.f32.mrf.mxu3  ;;  %v666_v38 = vpop.f32.mrf.mxu1  ;;  %v967_v20 = vrot.slane %v3099_v43, 1 }
 0x12a   : > { %v667_v52 = vadd.f32 %v666_v38, %v3376_v3  ;;  %v4404_v38 = vrot.slane %v3053_v16, 7 }
 0x12b   : > { %v1164_v17 = vadd.f32 %v1088_v45, %v857_v48  ;;  %v362_v48 = vrot.slane %v3053_v16, 5  ;;  %v3719_v13 = vsel %vm895_vm3, %v966_v9, %v967_v20 }
 0x12c   : > { %2472 = vmatmul.msk.f32.gmra.mxu1 %vm415_vm2, %v2950_v31  ;;  %v1245_v50 = vpop.f32.mrf.mxu0 }
 0x12d   : > { %v3695_v19 = vadd.f32 %v1242_v61, %v1164_v17  ;;  %2506 = vmatmul.msk.f32.gmra.mxu2 %vm415_vm2, %v3099_v43 }
 0x12e   : > { %2540 = vmatmul.msk.f32.gmra.mxu3 %vm415_vm2, %v3665_v8 }
 0x12f   : > { %4402 = vst [vmem:[#allocation57_spill] sm:$0xff] %v3695_v19  ;;  %2574 = vmatmul.msk.f32.gmra.mxu0 %vm415_vm2, %v3702_v25 }
 0x130   : > { %v784_v14 = vpop.f32.mrf.mxu2 }
 0x131   : > { %v858_v17 = vadd.f32 %v784_v14, %v667_v52  ;;  %v1091_v61 = vpop.f32.mrf.mxu3  ;;  %v669_v2 = vpop.f32.mrf.mxu1  ;;  %v3726_v52 = vsel %vm267_vm1, %v4404_v38, %v362_v48 }
 0x133   : > { %v1165_v44 = vadd.f32 %v1091_v61, %v858_v17 }
 0x134   : > { %2473 = vmatmul.msk.f32.gmra.mxu1 %vm415_vm2, %v2976_v47  ;;  %v1248_v3 = vpop.f32.mrf.mxu0 }
 0x135   : > { %v3712_v45 = vadd.f32 %v1245_v50, %v1165_v44  ;;  %2507 = vmatmul.msk.f32.gmra.mxu2 %vm415_vm2, %v3128_v37  ;;  %v670_v50 = vadd.f32 %v669_v2, %v3397_v56  ;;  %v969_v44 = vrot.slane %v3726_v52, 1 }
 0x136   : > { %2541 = vmatmul.msk.f32.gmra.mxu3 %vm415_vm2, %v3682_v49 }
 0x137   : > { %4403 = vst [vmem:[#allocation58_spill] sm:$0xff] %v3712_v45  ;;  %2575 = vmatmul.msk.f32.gmra.mxu0 %vm415_vm2, %v3719_v13  ;;  %v3739_v56 = vsel %vm895_vm3, %v967_v20, %v969_v44 }
 0x138   : > { %v787_v14 = vpop.f32.mrf.mxu2 }
 0x139   : > { %v859_v17 = vadd.f32 %v787_v14, %v670_v50  ;;  %v1094_v61 = vpop.f32.mrf.mxu3  ;;  %v672_v9 = vpop.f32.mrf.mxu1  ;;  %v363_v14 = vrot.slane %v3137_v60, 5 }
 0x13a   : > { %v673_v2 = vadd.f32 %v672_v9, %v3423_v62  ;;  %v4407_v9 = vrot.slane %v3137_v60, 7 }
 0x13b   : > { %v1166_v45 = vadd.f32 %v1094_v61, %v859_v17 }
 0x13c   : > { %2474 = vmatmul.msk.f32.gmra.mxu1 %vm415_vm2, %v3018_v59  ;;  %v1251_v16 = vpop.f32.mrf.mxu0 }
 0x13d   : > { %v3732_v19 = vadd.f32 %v1248_v3, %v1166_v45  ;;  %2508 = vmatmul.msk.f32.gmra.mxu2 %vm415_vm2, %v3170_v27  ;;  %v971_v45 = vrot.slane %v3128_v37, 1  ;;  %v972_v3 = vrot.slane %v3170_v27, 1 }
 0x13e   : > { %2542 = vmatmul.msk.f32.gmra.mxu3 %vm415_vm2, %v3702_v25 }
 0x13f   : > { %4405 = vst [vmem:[#allocation59_spill] sm:$0xff] %v3732_v19  ;;  %2576 = vmatmul.msk.f32.gmra.mxu0 %vm415_vm2, %v3739_v56  ;;  %v3756_v44 = vsel %vm895_vm3, %v971_v45, %v972_v3 }
 0x140   : > { %v790_v48 = vpop.f32.mrf.mxu2 }
 0x141   : > { %v860_v38 = vadd.f32 %v790_v48, %v673_v2  ;;  %v1097_v50 = vpop.f32.mrf.mxu3  ;;  %v675_v17 = vpop.f32.mrf.mxu1  ;;  %v3763_v2 = vsel %vm267_vm1, %v4407_v9, %v363_v14  ;;  %v1491_v14 = vrot.slane %v2992_v51, 2 }
 0x143   : > { %v1167_v20 = vadd.f32 %v1097_v50, %v860_v38 }
 0x144   : > { %2475 = vmatmul.msk.f32.gmra.mxu1 %vm415_vm2, %v3047_v12  ;;  %v1254_v62 = vpop.f32.mrf.mxu0 }
 0x145   : > { %v3749_v61 = vadd.f32 %v1251_v16, %v1167_v20  ;;  %2509 = vmatmul.msk.f32.gmra.mxu2 %vm415_vm2, %v3047_v12  ;;  %v676_v16 = vadd.f32 %v675_v17, %v3444_v4  ;;  %v974_v20 = vrot.slane %v3763_v2, 1  ;;  %v1492_v17 = vrot.slane %v3030_v63, 2 }
 0x146   : > { %2543 = vmatmul.msk.f32.gmra.mxu3 %vm415_vm2, %v3719_v13 }
 0x147   : > { %4406 = vst [vmem:[#allocation60_spill] sm:$0xff] %v3749_v61  ;;  %2577 = vmatmul.msk.f32.gmra.mxu0 %vm415_vm2, %v3756_v44  ;;  %v3776_v4 = vsel %vm895_vm3, %v972_v3, %v974_v20 }
 0x148   : > { %v793_v48 = vpop.f32.mrf.mxu2 }
 0x149   : > { %v861_v38 = vadd.f32 %v793_v48, %v676_v16  ;;  %v1100_v50 = vpop.f32.mrf.mxu3  ;;  %v678_v45 = vpop.f32.mrf.mxu1 }
 0x14a   : > { %v679_v9 = vadd.f32 %v678_v45, %v3470_v22  ;;  %v4410_v22 = vld [vmem:[#allocation23_spill] sm:$0xff] }
 0x14b   : > { %v1168_v61 = vadd.f32 %v1100_v50, %v861_v38  ;;  %v3788_v50 = vsel %vm1490_vm4, %v1491_v14, %v1492_v17  ;;  %v4411_v14 = vld [vmem:[#allocation13_spill] sm:$0xff] }
 0x14c   : > { %2476 = vmatmul.msk.f32.gmra.mxu1 %vm415_vm2, %v3099_v43  ;;  %v1257_v60 = vpop.f32.mrf.mxu0 }
 0x14d   : > { %v3769_v19 = vadd.f32 %v1254_v62, %v1168_v61  ;;  %2510 = vmatmul.msk.f32.gmra.mxu2 %vm415_vm2, %v3099_v43  ;;  %v1496_v61 = vrot.slane %v2931_v26, 2  ;;  %v1497_v62 = vrot.slane %v2962_v35, 2  ;;  %v1494_v35 = vrot.slane %v3197_v24, 2 }
 0x14e   : > { %2544 = vmatmul.msk.f32.gmra.mxu3 %vm415_vm2, %v3739_v56 }
 0x14f   : > { %4408 = vst [vmem:[#allocation61_spill] sm:$0xff] %v3769_v19  ;;  %2578 = vmatmul.msk.f32.gmra.mxu0 %vm415_vm2, %v3776_v4  ;;  %v1498_v63 = vsel %vm1490_vm4, %v1496_v61, %v1497_v62  ;;  %v4413_v19 = vld [vmem:[#allocation14_spill] sm:$0xff] }
 0x150   : > { %v796_v16 = vpop.f32.mrf.mxu2 }
 0x151   : > { %v862_v3 = vadd.f32 %v796_v16, %v679_v9  ;;  %v1103_v48 = vpop.f32.mrf.mxu3  ;;  %v681_v38 = vpop.f32.mrf.mxu1  ;;  %v1499_v9 = vrot.slane %v4411_v14, 2 }
 0x152   : > { %v682_v45 = vadd.f32 %v681_v38, %v4410_v22  ;;  %v4414_v38 = vld [vmem:[#allocation26_spill] sm:$0xff] }
 0x153   : > { %v1169_v51 = vadd.f32 %v1103_v48, %v862_v3 }
 0x154   : > { %2581 = vmatmul.msk.f32.vlgmr.msra.gmra.mxu1 %vm415_vm2, %v3192_v53  ;;  %v1260_v26 = vpop.f32.mrf.mxu0  ;;  %v1495_v53 = vsel %vm1490_vm4, %v1492_v17, %v1494_v35  ;;  %v4415_v35 = vld [vmem:[#allocation7_spill] sm:$0xff] }
 0x155   : > { %v3791_v20 = vadd.f32 %v1257_v60, %v1169_v51  ;;  %2615 = vmatmul.msk.f32.vlgmr.msra.gmra.mxu2 %vm415_vm2, %v3788_v50  ;;  %v1500_v51 = vsel %vm1490_vm4, %v1497_v62, %v1499_v9  ;;  %v4416_v62 = vld [vmem:[#allocation9_spill] sm:$0xff] }
 0x156   : > { %2649 = vmatmul.msk.f32.vlgmr.msra.gmra.mxu3 %vm415_vm2, %v1498_v63 }
 0x157   : > { %4409 = vst [vmem:[#allocation62_spill] sm:$0xff] %v3791_v20  ;;  %2683 = vmatmul.msk.f32.vlgmr.msra.gmra.mxu0 %vm415_vm2, %v3788_v50 }
 0x158   : > { %v799_v16 = vpop.f32.mrf.mxu2 }
 0x159   : > { %v863_v60 = vadd.f32 %v799_v16, %v682_v45  ;;  %v1106_v61 = vpop.f32.mrf.mxu3  ;;  %v684_v3 = vpop.f32.mrf.mxu1  ;;  %v1501_v16 = vrot.slane %v4415_v35, 2 }
 0x15a   : > { %v685_v22 = vadd.f32 %v684_v3, %v4414_v38  ;;  %v4419_v38 = vld [vmem:[#allocation30_spill] sm:$0xff] }
 0x15b   : > { %v1170_v48 = vadd.f32 %v1106_v61, %v863_v60 }
 0x15c   : > { %2582 = vmatmul.msk.f32.gmra.mxu1 %vm415_vm2, %v4413_v19  ;;  %v1263_v24 = vpop.f32.mrf.mxu0  ;;  %v4418_v19 = vld [vmem:[#allocation15_spill] sm:$0xff] }
 0x15d   : > { %v3805_v20 = vadd.f32 %v1260_v26, %v1170_v48  ;;  %2616 = vmatmul.msk.f32.gmra.mxu2 %vm415_vm2, %v1495_v53  ;;  %v1502_v26 = vrot.slane %v4416_v62, 2 }
 0x15e   : > { %2650 = vmatmul.msk.f32.gmra.mxu3 %vm415_vm2, %v1500_v51 }
 0x15f   : > { %4412 = vst [vmem:[#allocation23_spill] sm:$0xff] %v3805_v20  ;;  %2684 = vmatmul.msk.f32.gmra.mxu0 %vm415_vm2, %v1495_v53  ;;  %v1503_v3 = vsel %vm1490_vm4, %v1501_v16, %v1502_v26 }
 0x160   : > { %v802_v45 = vpop.f32.mrf.mxu2 }
 0x161   : > { %v864_v14 = vadd.f32 %v802_v45, %v685_v22  ;;  %v1109_v17 = vpop.f32.mrf.mxu3  ;;  %v687_v9 = vpop.f32.mrf.mxu1 }
 0x162   : > { %v688_v22 = vadd.f32 %v687_v9, %v4419_v38  ;;  %v4423_v9 = vld [vmem:[#allocation33_spill] sm:$0xff] }
 0x163   : > { %v1171_v60 = vadd.f32 %v1109_v17, %v864_v14 }
 0x164   : > { %2583 = vmatmul.msk.f32.gmra.mxu1 %vm415_vm2, %v4418_v19  ;;  %v1266_v48 = vpop.f32.mrf.mxu0 }
 0x165   : > { %v3815_v61 = vadd.f32 %v1263_v24, %v1171_v60  ;;  %2617 = vmatmul.msk.f32.gmra.mxu2 %vm415_vm2, %v1498_v63  ;;  %v4420_v24 = vld [vmem:[#allocation16_spill] sm:$0xff]  ;;  %v4422_v63 = vld [vmem:[#allocation17_spill] sm:$0xff] }
 0x166   : > { %2651 = vmatmul.msk.f32.gmra.mxu3 %vm415_vm2, %v3788_v50  ;;  %v1504_v17 = vrot.slane %v4420_v24, 2 }
 0x167   : > { %4417 = vst [vmem:[#allocation13_spill] sm:$0xff] %v3815_v61  ;;  %2685 = vmatmul.msk.f32.gmra.mxu0 %vm415_vm2, %v1503_v3 }
 0x168   : > { %v805_v45 = vpop.f32.mrf.mxu2  ;;  %v1505_v61 = vsel %vm1490_vm4, %v1502_v26, %v1504_v17 }
 0x169   : > { %v865_v35 = vadd.f32 %v805_v45, %v688_v22  ;;  %v1112_v14 = vpop.f32.mrf.mxu3  ;;  %v690_v62 = vpop.f32.mrf.mxu1 }
 0x16a   : > { %v691_v38 = vadd.f32 %v690_v62, %v4423_v9  ;;  %v4428_v62 = vld [vmem:[#allocation37_spill] sm:$0xff] }
 0x16b   : > { %v1172_v60 = vadd.f32 %v1112_v14, %v865_v35  ;;  %v4424_v35 = vld [vmem:[#allocation11_spill] sm:$0xff]  ;;  %v4425_v14 = vld [vmem:[#allocation12_spill] sm:$0xff] }
 0x16c   : > { %2584 = vmatmul.msk.f32.gmra.mxu1 %vm415_vm2, %v4422_v63  ;;  %v1269_v16 = vpop.f32.mrf.mxu0 }
 0x16d   : > { %v3826_v19 = vadd.f32 %v1266_v48, %v1172_v60  ;;  %2618 = vmatmul.msk.f32.gmra.mxu2 %vm415_vm2, %v1500_v51  ;;  %v1506_v48 = vrot.slane %v4424_v35, 2  ;;  %v1507_v60 = vrot.slane %v4425_v14, 2  ;;  %v4427_v51 = vld [vmem:[#allocation18_spill] sm:$0xff] }
 0x16e   : > { %2652 = vmatmul.msk.f32.gmra.mxu3 %vm415_vm2, %v1495_v53 }
 0x16f   : > { %4421 = vst [vmem:[#allocation14_spill] sm:$0xff] %v3826_v19  ;;  %2686 = vmatmul.msk.f32.gmra.mxu0 %vm415_vm2, %v1505_v61  ;;  %v1508_v17 = vsel %vm1490_vm4, %v1506_v48, %v1507_v60 }
 0x170   : > { %v808_v22 = vpop.f32.mrf.mxu2 }
 0x171   : > { %v866_v45 = vadd.f32 %v808_v22, %v691_v38  ;;  %v1115_v24 = vpop.f32.mrf.mxu3  ;;  %v693_v19 = vpop.f32.mrf.mxu1 }
 0x172   : > { %v694_v9 = vadd.f32 %v693_v19, %v4428_v62  ;;  %v4432_v19 = vld [vmem:[#allocation40_spill] sm:$0xff] }
 0x173   : > { %v1173_v63 = vadd.f32 %v1115_v24, %v866_v45 }
 0x174   : > { %2585 = vmatmul.msk.f32.gmra.mxu1 %vm415_vm2, %v4427_v51  ;;  %v1272_v26 = vpop.f32.mrf.mxu0  ;;  %v4431_v51 = vld [vmem:[#allocation20_spill] sm:$0xff] }
 0x175   : > { %v3837_v20 = vadd.f32 %v1269_v16, %v1173_v63  ;;  %2619 = vmatmul.msk.f32.gmra.mxu2 %vm415_vm2, %v3788_v50  ;;  %v4429_v16 = vld [vmem:[#allocation19_spill] sm:$0xff] }
 0x176   : > { %2653 = vmatmul.msk.f32.gmra.mxu3 %vm415_vm2, %v1503_v3  ;;  %v1509_v24 = vrot.slane %v4429_v16, 2 }
 0x177   : > { %4426 = vst [vmem:[#allocation26_spill] sm:$0xff] %v3837_v20  ;;  %2687 = vmatmul.msk.f32.gmra.mxu0 %vm415_vm2, %v1508_v17 }
 0x178   : > { %v811_v38 = vpop.f32.mrf.mxu2  ;;  %v1510_v48 = vsel %vm1490_vm4, %v1507_v60, %v1509_v24 }
 0x179   : > { %v867_v22 = vadd.f32 %v811_v38, %v694_v9  ;;  %v1118_v45 = vpop.f32.mrf.mxu3  ;;  %v696_v35 = vpop.f32.mrf.mxu1 }
 0x17a   : > { %v697_v62 = vadd.f32 %v696_v35, %v4432_v19  ;;  %v4437_v35 = vld [vmem:[#allocation43_spill] sm:$0xff] }
 0x17b   : > { %v1174_v14 = vadd.f32 %v1118_v45, %v867_v22  ;;  %v4433_v22 = vld [vmem:[#allocation2_spill] sm:$0xff]  ;;  %v4434_v45 = vld [vmem:[#allocation3_spill] sm:$0xff] }
 0x17c   : > { %2586 = vmatmul.msk.f32.gmra.mxu1 %vm415_vm2, %v4431_v51  ;;  %v1275_v50 = vpop.f32.mrf.mxu0 }
 0x17d   : > { %v3848_v63 = vadd.f32 %v1272_v26, %v1174_v14  ;;  %2620 = vmatmul.msk.f32.gmra.mxu2 %vm415_vm2, %v1495_v53  ;;  %v1511_v26 = vrot.slane %v4433_v22, 2  ;;  %v1512_v14 = vrot.slane %v4434_v45, 2  ;;  %v4436_v53 = vld [vmem:[#allocation21_spill] sm:$0xff] }
 0x17e   : > { %2654 = vmatmul.msk.f32.gmra.mxu3 %vm415_vm2, %v1505_v61 }
 0x17f   : > { %4430 = vst [vmem:[#allocation7_spill] sm:$0xff] %v3848_v63  ;;  %2688 = vmatmul.msk.f32.gmra.mxu0 %vm415_vm2, %v1510_v48  ;;  %v1513_v24 = vsel %vm1490_vm4, %v1511_v26, %v1512_v14 }
 0x180   : > { %v814_v9 = vpop.f32.mrf.mxu2 }
 0x181   : > { %v868_v38 = vadd.f32 %v814_v9, %v697_v62  ;;  %v1121_v16 = vpop.f32.mrf.mxu3  ;;  %v699_v63 = vpop.f32.mrf.mxu1 }
 0x182   : > { %v700_v19 = vadd.f32 %v699_v63, %v4437_v35  ;;  %v4441_v63 = vld [vmem:[#allocation45_spill] sm:$0xff] }
 0x183   : > { %v1175_v51 = vadd.f32 %v1121_v16, %v868_v38  ;;  %v4438_v38 = vld [vmem:[#allocation22_spill] sm:$0xff] }
 0x184   : > { %2587 = vmatmul.msk.f32.gmra.mxu1 %vm415_vm2, %v4436_v53  ;;  %v1278_v60 = vpop.f32.mrf.mxu0  ;;  %v4440_v53 = vld [vmem:[#allocation25_spill] sm:$0xff] }
 0x185   : > { %v3859_v20 = vadd.f32 %v1275_v50, %v1175_v51  ;;  %2621 = vmatmul.msk.f32.gmra.mxu2 %vm415_vm2, %v1503_v3  ;;  %v1514_v50 = vrot.slane %v4438_v38, 2 }
 0x186   : > { %2655 = vmatmul.msk.f32.gmra.mxu3 %vm415_vm2, %v1508_v17 }
 0x187   : > { %4435 = vst [vmem:[#allocation9_spill] sm:$0xff] %v3859_v20  ;;  %2689 = vmatmul.msk.f32.gmra.mxu0 %vm415_vm2, %v1513_v24  ;;  %v1515_v26 = vsel %vm1490_vm4, %v1512_v14, %v1514_v50 }
 0x188   : > { %v817_v62 = vpop.f32.mrf.mxu2 }
 0x189   : > { %v869_v9 = vadd.f32 %v817_v62, %v700_v19  ;;  %v1124_v22 = vpop.f32.mrf.mxu3  ;;  %v702_v16 = vpop.f32.mrf.mxu1 }
 0x18a   : > { %v703_v35 = vadd.f32 %v702_v16, %v4441_v63  ;;  %v4446_v16 = vld [vmem:[#allocation24_spill] sm:$0xff] }
 0x18b   : > { %v1176_v45 = vadd.f32 %v1124_v22, %v869_v9  ;;  %v4442_v9 = vld [vmem:[#allocation4_spill] sm:$0xff]  ;;  %v4443_v22 = vld [vmem:[#allocation5_spill] sm:$0xff] }
 0x18c   : > { %2588 = vmatmul.msk.f32.gmra.mxu1 %vm415_vm2, %v4440_v53  ;;  %v1281_v3 = vpop.f32.mrf.mxu0 }
 0x18d   : > { %v3869_v51 = vadd.f32 %v1278_v60, %v1176_v45  ;;  %2622 = vmatmul.msk.f32.gmra.mxu2 %vm415_vm2, %v1505_v61  ;;  %v1516_v60 = vrot.slane %v4442_v9, 2  ;;  %v1517_v45 = vrot.slane %v4443_v22, 2  ;;  %v4445_v61 = vld [vmem:[#allocation28_spill] sm:$0xff] }
 0x18e   : > { %2656 = vmatmul.msk.f32.gmra.mxu3 %vm415_vm2, %v1510_v48 }
 0x18f   : > { %4439 = vst [vmem:[#allocation15_spill] sm:$0xff] %v3869_v51  ;;  %2690 = vmatmul.msk.f32.gmra.mxu0 %vm415_vm2, %v1515_v26  ;;  %v1518_v50 = vsel %vm1490_vm4, %v1516_v60, %v1517_v45 }
 0x190   : > { %v820_v19 = vpop.f32.mrf.mxu2 }
 0x191   : > { %v870_v62 = vadd.f32 %v820_v19, %v703_v35  ;;  %v1127_v38 = vpop.f32.mrf.mxu3  ;;  %v705_v51 = vpop.f32.mrf.mxu1 }
 0x192   : > { %v706_v63 = vadd.f32 %v705_v51, %v4446_v16  ;;  %v4450_v51 = vld [vmem:[#allocation27_spill] sm:$0xff] }
 0x193   : > { %v1177_v53 = vadd.f32 %v1127_v38, %v870_v62  ;;  %v4447_v62 = vld [vmem:[#allocation29_spill] sm:$0xff] }
 0x194   : > { %2589 = vmatmul.msk.f32.gmra.mxu1 %vm415_vm2, %v4445_v61  ;;  %v1284_v14 = vpop.f32.mrf.mxu0  ;;  %v4449_v61 = vld [vmem:[#allocation32_spill] sm:$0xff] }
 0x195   : > { %v3880_v20 = vadd.f32 %v1281_v3, %v1177_v53  ;;  %2623 = vmatmul.msk.f32.gmra.mxu2 %vm415_vm2, %v1508_v17  ;;  %v1519_v3 = vrot.slane %v4447_v62, 2 }
 0x196   : > { %2657 = vmatmul.msk.f32.gmra.mxu3 %vm415_vm2, %v1513_v24 }
 0x197   : > { %4444 = vst [vmem:[#allocation30_spill] sm:$0xff] %v3880_v20  ;;  %2691 = vmatmul.msk.f32.gmra.mxu0 %vm415_vm2, %v1518_v50  ;;  %v1520_v60 = vsel %vm1490_vm4, %v1517_v45, %v1519_v3 }
 0x198   : > { %v823_v35 = vpop.f32.mrf.mxu2 }
 0x199   : > { %v871_v19 = vadd.f32 %v823_v35, %v706_v63  ;;  %v1130_v9 = vpop.f32.mrf.mxu3  ;;  %v708_v38 = vpop.f32.mrf.mxu1 }
 0x19a   : > { %v709_v16 = vadd.f32 %v708_v38, %v4450_v51  ;;  %v4454_v38 = vld [vmem:[#allocation31_spill] sm:$0xff] }
 0x19b   : > { %v1178_v22 = vadd.f32 %v1130_v9, %v871_v19  ;;  %v4451_v19 = vld [vmem:[#allocation6_spill] sm:$0xff]  ;;  %v4452_v9 = vld [vmem:[#allocation8_spill] sm:$0xff] }
 0x19c   : > { %2590 = vmatmul.msk.f32.gmra.mxu1 %vm415_vm2, %v4449_v61  ;;  %v1287_v17 = vpop.f32.mrf.mxu0 }
 0x19d   : > { %v3890_v53 = vadd.f32 %v1284_v14, %v1178_v22  ;;  %2624 = vmatmul.msk.f32.gmra.mxu2 %vm415_vm2, %v1510_v48  ;;  %v1521_v14 = vrot.slane %v4451_v19, 2  ;;  %v1522_v22 = vrot.slane %v4452_v9, 2  ;;  %v4453_v48 = vld [vmem:[#allocation35_spill] sm:$0xff] }
 0x19e   : > { %2658 = vmatmul.msk.f32.gmra.mxu3 %vm415_vm2, %v1515_v26 }
 0x19f   : > { %4448 = vst [vmem:[#allocation16_spill] sm:$0xff] %v3890_v53  ;;  %2692 = vmatmul.msk.f32.gmra.mxu0 %vm415_vm2, %v1520_v60  ;;  %v1523_v3 = vsel %vm1490_vm4, %v1521_v14, %v1522_v22 }
 0x1a0   : > { %v826_v63 = vpop.f32.mrf.mxu2 }
 0x1a1   : > { %v872_v35 = vadd.f32 %v826_v63, %v709_v16  ;;  %v1133_v62 = vpop.f32.mrf.mxu3  ;;  %v711_v53 = vpop.f32.mrf.mxu1 }
 0x1a2   : > { %v712_v51 = vadd.f32 %v711_v53, %v4454_v38  ;;  %v4458_v53 = vld [vmem:[#allocation34_spill] sm:$0xff] }
 0x1a3   : > { %v1179_v61 = vadd.f32 %v1133_v62, %v872_v35  ;;  %v4455_v35 = vld [vmem:[#allocation36_spill] sm:$0xff] }
 0x1a4   : > { %2591 = vmatmul.msk.f32.gmra.mxu1 %vm415_vm2, %v4453_v48  ;;  %v1290_v45 = vpop.f32.mrf.mxu0  ;;  %v4457_v48 = vld [vmem:[#allocation39_spill] sm:$0xff] }
 0x1a5   : > { %v3901_v20 = vadd.f32 %v1287_v17, %v1179_v61  ;;  %2625 = vmatmul.msk.f32.gmra.mxu2 %vm415_vm2, %v1513_v24  ;;  %v1524_v17 = vrot.slane %v4455_v35, 2 }
 0x1a6   : > { %2659 = vmatmul.msk.f32.gmra.mxu3 %vm415_vm2, %v1518_v50 }
 0x1a7   : > { %2693 = vmatmul.msk.f32.gmra.mxu0 %vm415_vm2, %v1523_v3  ;;  %v1525_v14 = vsel %vm1490_vm4, %v1522_v22, %v1524_v17  ;;  %v4460_v17 = vld [vmem:[#allocation38_spill] sm:$0xff] }
 0x1a8   : > { %v829_v16 = vpop.f32.mrf.mxu2 }
 0x1a9   : > { %v873_v63 = vadd.f32 %v829_v16, %v712_v51  ;;  %v1136_v19 = vpop.f32.mrf.mxu3  ;;  %v714_v62 = vpop.f32.mrf.mxu1 }
 0x1aa   : > { %v715_v38 = vadd.f32 %v714_v62, %v4458_v53 }
 0x1ab   : > { %v1180_v9 = vadd.f32 %v1136_v19, %v873_v63  ;;  %v4459_v63 = vld [vmem:[#allocation10_spill] sm:$0xff]  ;;  %v1527_v19 = vrot.slane %v3160_v7, 2 }
 0x1ac   : > { %2592 = vmatmul.msk.f32.gmra.mxu1 %vm415_vm2, %v4457_v48  ;;  %v1293_v24 = vpop.f32.mrf.mxu0 }
 0x1ad   : > { %v3911_v61 = vadd.f32 %v1290_v45, %v1180_v9  ;;  %2626 = vmatmul.msk.f32.gmra.mxu2 %vm415_vm2, %v1515_v26  ;;  %v1526_v45 = vrot.slane %v4459_v63, 2 }
 0x1ae   : > { %2660 = vmatmul.msk.f32.gmra.mxu3 %vm415_vm2, %v1520_v60 }
 0x1af   : > { %4456 = vst [vmem:[#allocation17_spill] sm:$0xff] %v3911_v61  ;;  %2694 = vmatmul.msk.f32.gmra.mxu0 %vm415_vm2, %v1525_v14  ;;  %v1528_v22 = vsel %vm1490_vm4, %v1526_v45, %v1527_v19  ;;  %v4462_v45 = vld [vmem:[#allocation41_spill] sm:$0xff] }
 0x1b0   : > { %v832_v51 = vpop.f32.mrf.mxu2 }
 0x1b1   : > { %v874_v16 = vadd.f32 %v832_v51, %v715_v38  ;;  %v1139_v35 = vpop.f32.mrf.mxu3  ;;  %v717_v9 = vpop.f32.mrf.mxu1  ;;  %v4461_v51 = vld [vmem:[#allocation42_spill] sm:$0xff] }
 0x1b2   : > { %v718_v62 = vadd.f32 %v717_v9, %v4460_v17 }
 0x1b3   : > { %v1181_v48 = vadd.f32 %v1139_v35, %v874_v16 }
 0x1b4   : > { %2593 = vmatmul.msk.f32.gmra.mxu1 %vm415_vm2, %v3454_v1  ;;  %v1296_v26 = vpop.f32.mrf.mxu0 }
 0x1b5   : > { %v3922_v61 = vadd.f32 %v1293_v24, %v1181_v48  ;;  %2627 = vmatmul.msk.f32.gmra.mxu2 %vm415_vm2, %v1518_v50  ;;  %v1529_v24 = vrot.slane %v4461_v51, 2  ;;  %v4463_v51 = vld [vmem:[#allocation44_spill] sm:$0xff] }
 0x1b6   : > { %2661 = vmatmul.msk.f32.gmra.mxu3 %vm415_vm2, %v1523_v3 }
 0x1b7   : > { %2695 = vmatmul.msk.f32.gmra.mxu0 %vm415_vm2, %v1528_v22  ;;  %v1530_v50 = vsel %vm1490_vm4, %v1527_v19, %v1529_v24 }
 0x1b8   : > { %v835_v53 = vpop.f32.mrf.mxu2 }
 0x1b9   : > { %v875_v7 = vadd.f32 %v835_v53, %v718_v62  ;;  %v1142_v38 = vpop.f32.mrf.mxu3  ;;  %v720_v16 = vpop.f32.mrf.mxu1  ;;  %v1532_v53 = vrot.slane %v2945_v30, 2 }
 0x1ba   : > { %v721_v9 = vadd.f32 %v720_v16, %v4462_v45 }
 0x1bb   : > { %v1182_v35 = vadd.f32 %v1142_v38, %v875_v7 }
 0x1bc   : > { %2594 = vmatmul.msk.f32.gmra.mxu1 %vm415_vm2, %v3479_v57  ;;  %v1299_v1 = vpop.f32.mrf.mxu0 }
 0x1bd   : > { %v3932_v63 = vadd.f32 %v1296_v26, %v1182_v35  ;;  %2628 = vmatmul.msk.f32.gmra.mxu2 %vm415_vm2, %v1520_v60  ;;  %v1531_v26 = vrot.slane %v2911_v18, 2  ;;  %v1534_v35 = vrot.slane %v3504_v29, 2 }
 0x1be   : > { %2662 = vmatmul.msk.f32.gmra.mxu3 %vm415_vm2, %v1525_v14 }
 0x1bf   : > { %2696 = vmatmul.msk.f32.gmra.mxu0 %vm415_vm2, %v1530_v50  ;;  %v1533_v19 = vsel %vm1490_vm4, %v1531_v26, %v1532_v53 }
 0x1c0   : > { %v838_v48 = vpop.f32.mrf.mxu2 }
 0x1c1   : > { %v876_v17 = vadd.f32 %v838_v48, %v721_v9  ;;  %v1145_v62 = vpop.f32.mrf.mxu3  ;;  %v723_v7 = vpop.f32.mrf.mxu1  ;;  %v4464_v48 = vld [vmem:[#allocation46_spill] sm:$0xff] }
 0x1c2   : > { %v724_v24 = vadd.f32 %v723_v7, %v4463_v51  ;;  %v1536_v7 = vrot.slane %v2973_v46, 2 }
 0x1c3   : > { %v1183_v57 = vadd.f32 %v1145_v62, %v876_v17 }
 0x1c4   : > { %2595 = vmatmul.msk.f32.gmra.mxu1 %vm415_vm2, %v3497_v0  ;;  %v1302_v60 = vpop.f32.mrf.mxu0 }
 0x1c5   : > { %v3943_v38 = vadd.f32 %v1299_v1, %v1183_v57  ;;  %2629 = vmatmul.msk.f32.gmra.mxu2 %vm415_vm2, %v1523_v3  ;;  %v3959_v3 = vsel %vm1490_vm4, %v1532_v53, %v1534_v35 }
 0x1c6   : > { %2663 = vmatmul.msk.f32.gmra.mxu3 %vm415_vm2, %v1528_v22 }
 0x1c7   : > { %2697 = vmatmul.msk.f32.gmra.mxu0 %vm415_vm2, %v1533_v19 }
 0x1c8   : > { %v841_v16 = vpop.f32.mrf.mxu2 }
 0x1c9   : > { %v877_v18 = vadd.f32 %v841_v16, %v724_v24  ;;  %v1148_v30 = vpop.f32.mrf.mxu3  ;;  %v726_v1 = vpop.f32.mrf.mxu1  ;;  %v4465_v24 = vld [vmem:[#allocation47_spill] sm:$0xff] }
 0x1ca   : > { %v727_v17 = vadd.f32 %v726_v1, %v4464_v48 }
 0x1cb   : > { %v1184_v45 = vadd.f32 %v1148_v30, %v877_v18  ;;  %v1539_v30 = vrot.slane %v3541_v39, 2  ;;  %v4466_v39 = vld [vmem:[#allocation48_spill] sm:$0xff] }
 0x1cc   : > { %2596 = vmatmul.msk.f32.gmra.mxu1 %vm415_vm2, %v3517_v40  ;;  %v1305_v0 = vpop.f32.mrf.mxu0  ;;  %v1537_v40 = vrot.slane %v3013_v58, 2 }
 0x1cd   : > { %v3953_v9 = vadd.f32 %v1302_v60, %v1184_v45  ;;  %2630 = vmatmul.msk.f32.gmra.mxu2 %vm415_vm2, %v1525_v14 }
 0x1ce   : > { %2664 = vmatmul.msk.f32.gmra.mxu3 %vm415_vm2, %v1530_v50  ;;  %v3973_v51 = vsel %vm1490_vm4, %v1536_v7, %v1537_v40  ;;  %v1542_v7 = vrot.slane %v3093_v41, 2 }
 0x1cf   : > { %2698 = vmatmul.msk.f32.gmra.mxu0 %vm415_vm2, %v3959_v3 }
 0x1d0   : > { %v844_v62 = vpop.f32.mrf.mxu2 }
 0x1d1   : > { %v878_v29 = vadd.f32 %v844_v62, %v727_v17  ;;  %v1151_v26 = vpop.f32.mrf.mxu3  ;;  %v1362_v57 = vpop.f32.mrf.mxu1 }
 0x1d2   : > { %v1458_v16 = vadd.f32 %v1362_v57, %v4465_v24 }
 0x1d3   : > { %v1185_v14 = vadd.f32 %v1151_v26, %v878_v29 }
 0x1d4   : > { %2597 = vmatmul.msk.f32.gmra.mxu1 %vm415_vm2, %v3534_v23  ;;  %v1957_v53 = vpop.f32.mrf.mxu0 }
 0x1d5   : > { %v3967_v60 = vadd.f32 %v1305_v0, %v1185_v14  ;;  %2631 = vmatmul.msk.f32.gmra.mxu2 %vm415_vm2, %v1528_v22  ;;  %v3983_v22 = vld [vmem:[%s4296_s2] ss:$0 sm:$0xff]  ;;  %v3989_v0 = vsel %vm1490_vm4, %v1537_v40, %v1539_v30 }
 0x1d6   : > { %2665 = vmatmul.msk.f32.gmra.mxu3 %vm415_vm2, %v1533_v19 }
 0x1d7   : > { %2699 = vmatmul.msk.f32.gmra.mxu0 %vm415_vm2, %v3973_v51 }
 0x1d8   : > { %v1653_v46 = vpop.f32.mrf.mxu2 }
 0x1d9   : > { %v1749_v58 = vadd.f32 %v1653_v46, %v1458_v16  ;;  %v1807_v18 = vpop.f32.mrf.mxu3  ;;  %v1365_v35 = vpop.f32.mrf.mxu1 }
 0x1da   : > { %v1459_v48 = vadd.f32 %v1365_v35, %v4466_v39 }
 0x1db   : > { %v1903_v23 = vadd.f32 %v1807_v18, %v1749_v58 }
 0x1dc   : > { %2598 = vmatmul.msk.f32.gmra.mxu1 %vm415_vm2, %v3554_v28  ;;  %v1960_v45 = vpop.f32.mrf.mxu0 }
 0x1dd   : > { %v2053_v1 = vadd.f32 %v1957_v53, %v1903_v23  ;;  %2632 = vmatmul.msk.f32.gmra.mxu2 %vm415_vm2, %v1530_v50  ;;  %v1541_v50 = vrot.slane %v3041_v10, 2  ;;  %v4467_v10 = vld [vmem:[#allocation49_spill] sm:$0xff] }
 0x1de   : > { %2666 = vmatmul.msk.f32.gmra.mxu3 %vm415_vm2, %v3959_v3 }
 0x1df   : > { %v2089_v17 = vadd.f32 %v3983_v22, %v2053_v1  ;;  %2700 = vmatmul.msk.f32.gmra.mxu0 %vm415_vm2, %v3989_v0  ;;  %v4003_v16 = vsel %vm1490_vm4, %v1541_v50, %v1542_v7 }
 0x1e0   : > { %v1656_v62 = vpop.f32.mrf.mxu2 }
 0x1e1   : > { %v2153_v29 = vmin.f32 %v2089_v17, 0.0  ;;  %v1750_v26 = vadd.f32 %v1656_v62, %v1459_v48  ;;  %v1810_v28 = vpop.f32.mrf.mxu3  ;;  %v1368_v40 = vpop.f32.mrf.mxu1  ;;  %vm2121_vm6 = vcmp.gt.f32.partialorder %v2089_v17, 0.0 }
 0x1e2   : > { %v1460_v41 = vadd.f32 %v1368_v40, %v4467_v10 }
 0x1e3   : > { %v2185_v57 = vmul.f32 1.442695, %v2153_v29  ;;  %v1904_v14 = vadd.f32 %v1810_v28, %v1750_v26  ;;  %v4468_v26 = vld [vmem:[#allocation50_spill] sm:$0xff] }
 0x1e4   : > { %2599 = vmatmul.msk.f32.gmra.mxu1 %vm415_vm2, %v3571_v6  ;;  %v1963_v24 = vpop.f32.mrf.mxu0 }
 0x1e5   : > { %2763 = vpow2.f32 %v2185_v57  ;;  %v2054_v53 = vadd.f32 %v1960_v45, %v1904_v14  ;;  %2633 = vmatmul.msk.f32.gmra.mxu2 %vm415_vm2, %v1533_v19  ;;  %v1544_v19 = vrot.slane %v3578_v42, 2 }
 0x1e6   : > { %2667 = vmatmul.msk.f32.gmra.mxu3 %vm415_vm2, %v3973_v51 }
 0x1e7   : > { %v2090_v46 = vadd.f32 %v3983_v22, %v2054_v53  ;;  %2701 = vmatmul.msk.f32.gmra.mxu0 %vm415_vm2, %v4003_v16  ;;  %v4024_v62 = vsel %vm1490_vm4, %v1542_v7, %v1544_v19  ;;  %v1546_v7 = vrot.slane %v3125_v36, 2 }
 0x1e8   : > { %v1659_v58 = vpop.f32.mrf.mxu2 }
 0x1e9   : > { %v2154_v18 = vmin.f32 %v2090_v46, 0.0  ;;  %v1751_v6 = vadd.f32 %v1659_v58, %v1460_v41  ;;  %v1813_v30 = vpop.f32.mrf.mxu3  ;;  %v1371_v35 = vpop.f32.mrf.mxu1  ;;  %vm2122_vm7 = vcmp.gt.f32.partialorder %v2090_v46, 0.0 }
 0x1ea   : > { %v1461_v28 = vadd.f32 %v1371_v35, %v4468_v26 }
 0x1eb   : > { %v2764_v23 = vpop.eup %2763  ;;  %v2187_v1 = vmul.f32 1.442695, %v2154_v18  ;;  %v1905_v45 = vadd.f32 %v1813_v30, %v1751_v6 }
 0x1ec   : > { %v2715_v39 = vadd.f32 -1.0, %v2764_v23  ;;  %2600 = vmatmul.msk.f32.gmra.mxu1 %vm415_vm2, %v3591_v5  ;;  %v1966_v42 = vpop.f32.mrf.mxu0 }
 0x1ed   : > { %2765 = vpow2.f32 %v2187_v1  ;;  %v2055_v48 = vadd.f32 %v1963_v24, %v1905_v45  ;;  %2634 = vmatmul.msk.f32.gmra.mxu2 %vm415_vm2, %v3959_v3  ;;  %v1549_v1 = vrot.slane %v3615_v33, 2  ;;  %v4470_v33 = vld [vmem:[#allocation52_spill] sm:$0xff] }
 0x1ee   : > { %v2281_v29 = vsel %vm2121_vm6, %v2089_v17, %v2715_v39  ;;  %2668 = vmatmul.msk.f32.gmra.mxu3 %vm415_vm2, %v3989_v0  ;;  %v1547_v17 = vrot.slane %v3165_v55, 2  ;;  %v4469_v55 = vld [vmem:[#allocation51_spill] sm:$0xff] }
 0x1ef   : > { %2314 = vst.msk [vmem:[%s4017_s15] sm:$0xff] %vm2313_vm5, %v2281_v29  ;;  %v2091_v50 = vadd.f32 %v3983_v22, %v2055_v48  ;;  %2702 = vmatmul.msk.f32.gmra.mxu0 %vm415_vm2, %v4024_v62 }
 0x1f0   : > { %v1662_v40 = vpop.f32.mrf.mxu2  ;;  %v4041_v36 = vsel %vm1490_vm4, %v1546_v7, %v1547_v17 }
 0x1f1   : > { %v2155_v5 = vmin.f32 %v2091_v50, 0.0  ;;  %v1752_v3 = vadd.f32 %v1662_v40, %v1461_v28  ;;  %v1816_v57 = vpop.f32.mrf.mxu3  ;;  %v1374_v14 = vpop.f32.mrf.mxu1  ;;  %vm2123_vm8 = vcmp.gt.f32.partialorder %v2091_v50, 0.0  ;;  %v4057_v28 = vsel %vm1490_vm4, %v1547_v17, %v1549_v1 }
 0x1f2   : > { %v1462_v30 = vadd.f32 %v1374_v14, %v4469_v55  ;;  %v1551_v17 = vrot.slane %v2921_v21, 2 }
 0x1f3   : > { %v2766_v53 = vpop.eup %2765  ;;  %v2189_v24 = vmul.f32 1.442695, %v2155_v5  ;;  %v1906_v10 = vadd.f32 %v1816_v57, %v1752_v3 }
 0x1f4   : > { %v2716_v41 = vadd.f32 -1.0, %v2766_v53  ;;  %2601 = vmatmul.msk.f32.gmra.mxu1 %vm415_vm2, %v3608_v11  ;;  %v1969_v18 = vpop.f32.mrf.mxu0 }
 0x1f5   : > { %2767 = vpow2.f32 %v2189_v24  ;;  %v2056_v58 = vadd.f32 %v1966_v42, %v1906_v10  ;;  %2635 = vmatmul.msk.f32.gmra.mxu2 %vm415_vm2, %v3973_v51 }
 0x1f6   : > { %v2282_v6 = vsel %vm2122_vm7, %v2090_v46, %v2716_v41  ;;  %2669 = vmatmul.msk.f32.gmra.mxu3 %vm415_vm2, %v4003_v16 }
 0x1f7   : > { %2315 = vst.msk [vmem:[%s4017_s15 + $0x8] sm:$0xff] %vm2313_vm5, %v2282_v6  ;;  %v2092_v19 = vadd.f32 %v3983_v22, %v2056_v58  ;;  %2703 = vmatmul.msk.f32.gmra.mxu0 %vm415_vm2, %v4041_v36 }
 0x1f8   : > { %v1665_v35 = vpop.f32.mrf.mxu2 }
 0x1f9   : > { %v2156_v11 = vmin.f32 %v2092_v19, 0.0  ;;  %v1753_v51 = vadd.f32 %v1665_v35, %v1462_v30  ;;  %v1819_v23 = vpop.f32.mrf.mxu3  ;;  %v1377_v46 = vpop.f32.mrf.mxu1  ;;  %vm2124_vm9 = vcmp.gt.f32.partialorder %v2092_v19, 0.0 }
 0x1fa   : > { %v1463_v5 = vadd.f32 %v1377_v46, %v4470_v33 }
 0x1fb   : > { %v2768_v45 = vpop.eup %2767  ;;  %v2191_v39 = vmul.f32 1.442695, %v2156_v11  ;;  %v1907_v48 = vadd.f32 %v1819_v23, %v1753_v51  ;;  %v1554_v51 = vrot.slane %v3652_v34, 2  ;;  %v4472_v34 = vld [vmem:[#allocation54_spill] sm:$0xff] }
 0x1fc   : > { %v2717_v42 = vadd.f32 -1.0, %v2768_v45  ;;  %2602 = vmatmul.msk.f32.gmra.mxu1 %vm415_vm2, %v3628_v54  ;;  %v1972_v26 = vpop.f32.mrf.mxu0 }
 0x1fd   : > { %2769 = vpow2.f32 %v2191_v39  ;;  %v2057_v29 = vadd.f32 %v1969_v18, %v1907_v48  ;;  %2636 = vmatmul.msk.f32.gmra.mxu2 %vm415_vm2, %v3989_v0 }
 0x1fe   : > { %v2283_v40 = vsel %vm2123_vm8, %v2091_v50, %v2717_v42  ;;  %2670 = vmatmul.msk.f32.gmra.mxu3 %vm415_vm2, %v4024_v62  ;;  %v1552_v50 = vrot.slane %v2950_v31, 2  ;;  %v4471_v31 = vld [vmem:[#allocation53_spill] sm:$0xff] }
 0x1ff   : > { %2316 = vst.msk [vmem:[%s4017_s15 + $0x10] sm:$0xff] %vm2313_vm5, %v2283_v40  ;;  %v2093_v3 = vadd.f32 %v3983_v22, %v2057_v29  ;;  %2704 = vmatmul.msk.f32.gmra.mxu0 %vm415_vm2, %v4057_v28 }
 0x200   : > { %v1668_v57 = vpop.f32.mrf.mxu2  ;;  %v4074_v21 = vsel %vm1490_vm4, %v1551_v17, %v1552_v50  ;;  %v4090_v42 = vsel %vm1490_vm4, %v1552_v50, %v1554_v51 }
 0x201   : > { %v2157_v54 = vmin.f32 %v2093_v3, 0.0  ;;  %v1754_v0 = vadd.f32 %v1668_v57, %v1463_v5  ;;  %v1822_v7 = vpop.f32.mrf.mxu3  ;;  %v1380_v14 = vpop.f32.mrf.mxu1  ;;  %vm2125_vm10 = vcmp.gt.f32.partialorder %v2093_v3, 0.0  ;;  %v1556_v57 = vrot.slane %v2976_v47, 2 }
 0x202   : > { %v1464_v55 = vadd.f32 %v1380_v14, %v4471_v31 }
 0x203   : > { %v2770_v53 = vpop.eup %2769  ;;  %v2193_v24 = vmul.f32 1.442695, %v2157_v54  ;;  %v1908_v10 = vadd.f32 %v1822_v7, %v1754_v0 }
 0x204   : > { %v2718_v41 = vadd.f32 -1.0, %v2770_v53  ;;  %2603 = vmatmul.msk.f32.gmra.mxu1 %vm415_vm2, %v3645_v15  ;;  %v1975_v18 = vpop.f32.mrf.mxu0 }
 0x205   : > { %2771 = vpow2.f32 %v2193_v24  ;;  %v2058_v58 = vadd.f32 %v1972_v26, %v1908_v10  ;;  %2637 = vmatmul.msk.f32.gmra.mxu2 %vm415_vm2, %v4003_v16 }
 0x206   : > { %v2284_v6 = vsel %vm2124_vm9, %v2092_v19, %v2718_v41  ;;  %2671 = vmatmul.msk.f32.gmra.mxu3 %vm415_vm2, %v4041_v36 }
 0x207   : > { %2317 = vst.msk [vmem:[%s4017_s15 + $0x18] sm:$0xff] %vm2313_vm5, %v2284_v6  ;;  %v2094_v30 = vadd.f32 %v3983_v22, %v2058_v58  ;;  %2705 = vmatmul.msk.f32.gmra.mxu0 %vm415_vm2, %v4074_v21  ;;  %v1559_v6 = vrot.slane %v3689_v32, 2  ;;  %v4474_v32 = vld [vmem:[#allocation56_spill] sm:$0xff] }
 0x208   : > { %v1671_v35 = vpop.f32.mrf.mxu2 }
 0x209   : > { %v2158_v15 = vmin.f32 %v2094_v30, 0.0  ;;  %v1755_v16 = vadd.f32 %v1671_v35, %v1464_v55  ;;  %v1825_v11 = vpop.f32.mrf.mxu3  ;;  %v1383_v19 = vpop.f32.mrf.mxu1  ;;  %vm2126_vm11 = vcmp.gt.f32.partialorder %v2094_v30, 0.0 }
 0x20a   : > { %v1465_v26 = vadd.f32 %v1383_v19, %v4472_v34 }
 0x20b   : > { %v2772_v23 = vpop.eup %2771  ;;  %v2195_v1 = vmul.f32 1.442695, %v2158_v15  ;;  %v1909_v46 = vadd.f32 %v1825_v11, %v1755_v16 }
 0x20c   : > { %v2719_v45 = vadd.f32 -1.0, %v2772_v23  ;;  %2604 = vmatmul.msk.f32.gmra.mxu1 %vm415_vm2, %v3665_v8  ;;  %v1978_v48 = vpop.f32.mrf.mxu0 }
 0x20d   : > { %2773 = vpow2.f32 %v2195_v1  ;;  %v2059_v39 = vadd.f32 %v1975_v18, %v1909_v46  ;;  %2638 = vmatmul.msk.f32.gmra.mxu2 %vm415_vm2, %v4024_v62 }
 0x20e   : > { %v2285_v29 = vsel %vm2125_vm10, %v2093_v3, %v2719_v45  ;;  %2672 = vmatmul.msk.f32.gmra.mxu3 %vm415_vm2, %v4057_v28  ;;  %v1557_v3 = vrot.slane %v3018_v59, 2  ;;  %v4473_v59 = vld [vmem:[#allocation55_spill] sm:$0xff] }
 0x20f   : > { %2318 = vst.msk [vmem:[%s4017_s15 + $0x20] sm:$0xff] %vm2313_vm5, %v2285_v29  ;;  %v2095_v40 = vadd.f32 %v3983_v22, %v2059_v39  ;;  %2706 = vmatmul.msk.f32.gmra.mxu0 %vm415_vm2, %v4090_v42  ;;  %v1561_v39 = vrot.slane %v3047_v12, 2 }
 0x210   : > { %v1674_v33 = vpop.f32.mrf.mxu2  ;;  %v4107_v47 = vsel %vm1490_vm4, %v1556_v57, %v1557_v3  ;;  %v4123_v51 = vsel %vm1490_vm4, %v1557_v3, %v1559_v6 }
 0x211   : > { %v2159_v8 = vmin.f32 %v2095_v40, 0.0  ;;  %v1756_v62 = vadd.f32 %v1674_v33, %v1465_v26  ;;  %v1828_v5 = vpop.f32.mrf.mxu3  ;;  %v1386_v54 = vpop.f32.mrf.mxu1  ;;  %vm2127_vm12 = vcmp.gt.f32.partialorder %v2095_v40, 0.0 }
 0x212   : > { %v1466_v10 = vadd.f32 %v1386_v54, %v4473_v59 }
 0x213   : > { %v2774_v0 = vpop.eup %2773  ;;  %v2197_v7 = vmul.f32 1.442695, %v2159_v8  ;;  %v1910_v17 = vadd.f32 %v1828_v5, %v1756_v62 }
 0x214   : > { %v2720_v50 = vadd.f32 -1.0, %v2774_v0  ;;  %2605 = vmatmul.msk.f32.gmra.mxu1 %vm415_vm2, %v3682_v49  ;;  %v1981_v53 = vpop.f32.mrf.mxu0 }
 0x215   : > { %2775 = vpow2.f32 %v2197_v7  ;;  %v2060_v14 = vadd.f32 %v1978_v48, %v1910_v17  ;;  %2639 = vmatmul.msk.f32.gmra.mxu2 %vm415_vm2, %v4041_v36  ;;  %v1562_v48 = vrot.slane %v3099_v43, 2  ;;  %v4475_v43 = vld [vmem:[#allocation57_spill] sm:$0xff]  ;;  %v1564_v17 = vrot.slane %v3726_v52, 2  ;;  %v4476_v52 = vld [vmem:[#allocation58_spill] sm:$0xff] }
 0x216   : > { %v2286_v24 = vsel %vm2126_vm11, %v2094_v30, %v2720_v50  ;;  %2673 = vmatmul.msk.f32.gmra.mxu3 %vm415_vm2, %v4074_v21 }
 0x217   : > { %2319 = vst.msk [vmem:[%s4017_s15 + $0x28] sm:$0xff] %vm2313_vm5, %v2286_v24  ;;  %v2096_v41 = vadd.f32 %v3983_v22, %v2060_v14  ;;  %2707 = vmatmul.msk.f32.gmra.mxu0 %vm415_vm2, %v4107_v47  ;;  %v4140_v12 = vsel %vm1490_vm4, %v1561_v39, %v1562_v48 }
 0x218   : > { %v1677_v58 = vpop.f32.mrf.mxu2 }
 0x219   : > { %v2160_v49 = vmin.f32 %v2096_v41, 0.0  ;;  %v1757_v36 = vadd.f32 %v1677_v58, %v1466_v10  ;;  %v1831_v18 = vpop.f32.mrf.mxu3  ;;  %v1389_v31 = vpop.f32.mrf.mxu1  ;;  %vm2128_vm13 = vcmp.gt.f32.partialorder %v2096_v41, 0.0  ;;  %v4156_v58 = vsel %vm1490_vm4, %v1562_v48, %v1564_v17 }
 0x21a   : > { %v1467_v23 = vadd.f32 %v1389_v31, %v4474_v32  ;;  %v1567_v31 = vrot.slane %v3170_v27, 2 }
 0x21b   : > { %v2776_v55 = vpop.eup %2775  ;;  %v2199_v30 = vmul.f32 1.442695, %v2160_v49  ;;  %v1911_v35 = vadd.f32 %v1831_v18, %v1757_v36 }
 0x21c   : > { %v2721_v15 = vadd.f32 -1.0, %v2776_v55  ;;  %2606 = vmatmul.msk.f32.gmra.mxu1 %vm415_vm2, %v3702_v25  ;;  %v1984_v11 = vpop.f32.mrf.mxu0 }
 0x21d   : > { %2777 = vpow2.f32 %v2199_v30  ;;  %v2061_v16 = vadd.f32 %v1981_v53, %v1911_v35  ;;  %2640 = vmatmul.msk.f32.gmra.mxu2 %vm415_vm2, %v4057_v28 }
 0x21e   : > { %v2287_v19 = vsel %vm2127_vm12, %v2095_v40, %v2721_v15  ;;  %2674 = vmatmul.msk.f32.gmra.mxu3 %vm415_vm2, %v4090_v42 }
 0x21f   : > { %2320 = vst.msk [vmem:[%s4017_s15 + $0x30] sm:$0xff] %vm2313_vm5, %v2287_v19  ;;  %v2097_v1 = vadd.f32 %v3983_v22, %v2061_v16  ;;  %2708 = vmatmul.msk.f32.gmra.mxu0 %vm415_vm2, %v4123_v51 }
 0x220   : > { %v1680_v46 = vpop.f32.mrf.mxu2 }
 0x221   : > { %v2161_v25 = vmin.f32 %v2097_v1, 0.0  ;;  %v1758_v28 = vadd.f32 %v1680_v46, %v1467_v23  ;;  %v1834_v45 = vpop.f32.mrf.mxu3  ;;  %v1392_v29 = vpop.f32.mrf.mxu1  ;;  %vm2129_vm14 = vcmp.gt.f32.partialorder %v2097_v1, 0.0  ;;  %v4477_v46 = vld [vmem:[#allocation59_spill] sm:$0xff] }
 0x222   : > { %v1468_v57 = vadd.f32 %v1392_v29, %v4475_v43 }
 0x223   : > { %v2778_v34 = vpop.eup %2777  ;;  %v2201_v26 = vmul.f32 1.442695, %v2161_v25  ;;  %v1912_v40 = vadd.f32 %v1834_v45, %v1758_v28 }
 0x224   : > { %v2722_v33 = vadd.f32 -1.0, %v2778_v34  ;;  %2607 = vmatmul.msk.f32.gmra.mxu1 %vm415_vm2, %v3719_v13  ;;  %v1987_v62 = vpop.f32.mrf.mxu0 }
 0x225   : > { %2779 = vpow2.f32 %v2201_v26  ;;  %v2062_v8 = vadd.f32 %v1984_v11, %v1912_v40  ;;  %2641 = vmatmul.msk.f32.gmra.mxu2 %vm415_vm2, %v4074_v21 }
 0x226   : > { %v2288_v5 = vsel %vm2128_vm13, %v2096_v41, %v2722_v33  ;;  %2675 = vmatmul.msk.f32.gmra.mxu3 %vm415_vm2, %v4107_v47 }
 0x227   : > { %2321 = vst.msk [vmem:[%s4017_s15 + $0x38] sm:$0xff] %vm2313_vm5, %v2288_v5  ;;  %v2098_v3 = vadd.f32 %v3983_v22, %v2062_v8  ;;  %2709 = vmatmul.msk.f32.gmra.mxu0 %vm415_vm2, %v4140_v12 }
 0x228   : > { %v1683_v54 = vpop.f32.mrf.mxu2 }
 0x229   : > { %v2162_v0 = vmin.f32 %v2098_v3, 0.0  ;;  %v1759_v21 = vadd.f32 %v1683_v54, %v1468_v57  ;;  %v1837_v7 = vpop.f32.mrf.mxu3  ;;  %v1395_v50 = vpop.f32.mrf.mxu1  ;;  %vm2130_vm15 = vcmp.gt.f32.partialorder %v2098_v3, 0.0 }
 0x22a   : > { %v1469_v36 = vadd.f32 %v1395_v50, %v4476_v52 }
 0x22b   : > { %v2780_v14 = vpop.eup %2779  ;;  %v2203_v53 = vmul.f32 1.442695, %v2162_v0  ;;  %v1913_v24 = vadd.f32 %v1837_v7, %v1759_v21 }
 0x22c   : > { %v2723_v59 = vadd.f32 -1.0, %v2780_v14  ;;  %2608 = vmatmul.msk.f32.gmra.mxu1 %vm415_vm2, %v3739_v56  ;;  %v1990_v41 = vpop.f32.mrf.mxu0 }
 0x22d   : > { %2781 = vpow2.f32 %v2203_v53  ;;  %v2063_v10 = vadd.f32 %v1987_v62, %v1913_v24  ;;  %2642 = vmatmul.msk.f32.gmra.mxu2 %vm415_vm2, %v4090_v42  ;;  %v1566_v42 = vrot.slane %v3128_v37, 2 }
 0x22e   : > { %v2289_v49 = vsel %vm2129_vm14, %v2097_v1, %v2723_v59  ;;  %2676 = vmatmul.msk.f32.gmra.mxu3 %vm415_vm2, %v4123_v51 }
 0x22f   : > { %2322 = vst.msk [vmem:[%s4017_s15 + $0x40] sm:$0xff] %vm2313_vm5, %v2289_v49  ;;  %v2099_v18 = vadd.f32 %v3983_v22, %v2063_v10  ;;  %2710 = vmatmul.msk.f32.gmra.mxu0 %vm415_vm2, %v4156_v58  ;;  %v1568_v27 = vsel %vm1490_vm4, %v1566_v42, %v1567_v31  ;;  %v4479_v10 = vld [vmem:[#allocation61_spill] sm:$0xff] }
 0x230   : > { %v1686_v6 = vpop.f32.mrf.mxu2 }
 0x231   : > { %v2163_v55 = vmin.f32 %v2099_v18, 0.0  ;;  %v1760_v30 = vadd.f32 %v1686_v6, %v1469_v36  ;;  %v1840_v35 = vpop.f32.mrf.mxu3  ;;  %v1398_v15 = vpop.f32.mrf.mxu1  ;;  %vm2131_vm0 = vcmp.gt.f32.partialorder %v2099_v18, 0.0 }
 0x232   : > { %v1470_v25 = vadd.f32 %v1398_v15, %v4477_v46 }
 0x233   : > { %v2782_v16 = vpop.eup %2781  ;;  %v2205_v11 = vmul.f32 1.442695, %v2163_v55  ;;  %v1914_v19 = vadd.f32 %v1840_v35, %v1760_v30 }
 0x234   : > { %v2724_v32 = vadd.f32 -1.0, %v2782_v16  ;;  %2609 = vmatmul.msk.f32.gmra.mxu1 %vm415_vm2, %v3756_v44  ;;  %v1993_v37 = vpop.f32.mrf.mxu0  ;;  %v4480_v16 = vld [vmem:[#allocation62_spill] sm:$0xff] }
 0x235   : > { %2783 = vpow2.f32 %v2205_v11  ;;  %v2064_v23 = vadd.f32 %v1990_v41, %v1914_v19  ;;  %2643 = vmatmul.msk.f32.gmra.mxu2 %vm415_vm2, %v4107_v47  ;;  %v1569_v47 = vrot.slane %v3763_v2, 2  ;;  %v4478_v2 = vld [vmem:[#allocation60_spill] sm:$0xff] }
 0x236   : > { %v2290_v1 = vsel %vm2130_vm15, %v2098_v3, %v2724_v32  ;;  %2677 = vmatmul.msk.f32.gmra.mxu3 %vm415_vm2, %v4140_v12 }
 0x237   : > { %2323 = vst.msk [vmem:[%s4017_s15 + $0x48] sm:$0xff] %vm2313_vm5, %v2290_v1  ;;  %v2100_v28 = vadd.f32 %v3983_v22, %v2064_v23  ;;  %2711 = vmatmul.msk.f32.gmra.mxu0 %vm415_vm2, %v1568_v27  ;;  %v1570_v5 = vsel %vm1490_vm4, %v1567_v31, %v1569_v47 }
 0x238   : > { %v1689_v45 = vpop.f32.mrf.mxu2 }
 0x239   : > { %v2164_v44 = vmin.f32 %v2100_v28, 0.0  ;;  %v1761_v39 = vadd.f32 %v1689_v45, %v1470_v25  ;;  %v1843_v48 = vpop.f32.mrf.mxu3  ;;  %v1401_v29 = vpop.f32.mrf.mxu1  ;;  %vm2132_vm1 = vcmp.gt.f32.partialorder %v2100_v28, 0.0 }
 0x23a   : > { %v1471_v57 = vadd.f32 %v1401_v29, %v4478_v2 }
 0x23b   : > { %v2784_v34 = vpop.eup %2783  ;;  %v2207_v26 = vmul.f32 1.442695, %v2164_v44  ;;  %v1915_v40 = vadd.f32 %v1843_v48, %v1761_v39  ;;  %v4481_v48 = vld [vmem:[#allocation23_spill] sm:$0xff] }
 0x23c   : > { %v2725_v33 = vadd.f32 -1.0, %v2784_v34  ;;  %2610 = vmatmul.msk.f32.gmra.mxu1 %vm415_vm2, %v3776_v4  ;;  %v1996_v62 = vpop.f32.mrf.mxu0 }
 0x23d   : > { %2785 = vpow2.f32 %v2207_v26  ;;  %v2065_v8 = vadd.f32 %v1993_v37, %v1915_v40  ;;  %2644 = vmatmul.msk.f32.gmra.mxu2 %vm415_vm2, %v4123_v51 }
 0x23e   : > { %v2291_v43 = vsel %vm2131_vm0, %v2099_v18, %v2725_v33  ;;  %2678 = vmatmul.msk.f32.gmra.mxu3 %vm415_vm2, %v4156_v58 }
 0x23f   : > { %2324 = vst.msk [vmem:[%s4017_s15 + $0x50] sm:$0xff] %vm2313_vm5, %v2291_v43  ;;  %v2101_v3 = vadd.f32 %v3983_v22, %v2065_v8  ;;  %2712 = vmatmul.msk.f32.gmra.mxu0 %vm415_vm2, %v1570_v5 }
 0x240   : > { %v1692_v54 = vpop.f32.mrf.mxu2 }
 0x241   : > { %v2165_v4 = vmin.f32 %v2101_v3, 0.0  ;;  %v1762_v0 = vadd.f32 %v1692_v54, %v1471_v57  ;;  %v1846_v51 = vpop.f32.mrf.mxu3  ;;  %v1404_v21 = vpop.f32.mrf.mxu1  ;;  %vm2133_vm3 = vcmp.gt.f32.partialorder %v2101_v3, 0.0  ;;  %v4482_v54 = vld [vmem:[#allocation13_spill] sm:$0xff] }
 0x242   : > { %v1472_v41 = vadd.f32 %v1404_v21, %v4479_v10 }
 0x243   : > { %v2786_v7 = vpop.eup %2785  ;;  %v2209_v17 = vmul.f32 1.442695, %v2165_v4  ;;  %v1916_v50 = vadd.f32 %v1846_v51, %v1762_v0 }
 0x244   : > { %v2726_v14 = vadd.f32 -1.0, %v2786_v7  ;;  %2611 = vmatmul.msk.f32.gmra.mxu1 %vm415_vm2, %v3719_v13  ;;  %v1999_v24 = vpop.f32.mrf.mxu0 }
 0x245   : > { %2787 = vpow2.f32 %v2209_v17  ;;  %v2066_v53 = vadd.f32 %v1996_v62, %v1916_v50  ;;  %2645 = vmatmul.msk.f32.gmra.mxu2 %vm415_vm2, %v4140_v12 }
 0x246   : > { %v2292_v59 = vsel %vm2132_vm1, %v2100_v28, %v2726_v14  ;;  %2679 = vmatmul.msk.f32.gmra.mxu3 %vm415_vm2, %v1568_v27 }
 0x247   : > { %2325 = vst.msk [vmem:[%s4017_s15 + $0x58] sm:$0xff] %vm2313_vm5, %v2292_v59  ;;  %v2102_v49 = vadd.f32 %v3983_v22, %v2066_v53  ;;  %2713 = vmatmul.msk.f32.gmra.mxu0 %vm415_vm2, %v4140_v12 }
 0x248   : > { %v1695_v52 = vpop.f32.mrf.mxu2 }
 0x249   : > { %v2166_v36 = vmin.f32 %v2102_v49, 0.0  ;;  %v1763_v13 = vadd.f32 %v1695_v52, %v1472_v41  ;;  %v1849_v18 = vpop.f32.mrf.mxu3  ;;  %v1407_v6 = vpop.f32.mrf.mxu1  ;;  %vm2134_vm4 = vcmp.gt.f32.partialorder %v2102_v49, 0.0  ;;  %v4483_v52 = vld [vmem:[#allocation14_spill] sm:$0xff] }
 0x24a   : > { %v1473_v11 = vadd.f32 %v1407_v6, %v4480_v16 }
 0x24b   : > { %v2788_v42 = vpop.eup %2787  ;;  %v2211_v31 = vmul.f32 1.442695, %v2166_v36  ;;  %v1917_v55 = vadd.f32 %v1849_v18, %v1763_v13 }
 0x24c   : > { %v2727_v30 = vadd.f32 -1.0, %v2788_v42  ;;  %2612 = vmatmul.msk.f32.gmra.mxu1 %vm415_vm2, %v3739_v56  ;;  %v2002_v15 = vpop.f32.mrf.mxu0 }
 0x24d   : > { %2789 = vpow2.f32 %v2211_v31  ;;  %v2067_v35 = vadd.f32 %v1999_v24, %v1917_v55  ;;  %2646 = vmatmul.msk.f32.gmra.mxu2 %vm415_vm2, %v4156_v58 }
 0x24e   : > { %v2293_v12 = vsel %vm2133_vm3, %v2101_v3, %v2727_v30  ;;  %2680 = vmatmul.msk.f32.gmra.mxu3 %vm415_vm2, %v1570_v5 }
 0x24f   : > { %2326 = vst.msk [vmem:[%s4017_s15 + $0x60] sm:$0xff] %vm2313_vm5, %v2293_v12  ;;  %v2103_v19 = vadd.f32 %v3983_v22, %v2067_v35  ;;  %2714 = vmatmul.msk.f32.gmra.mxu0 %vm415_vm2, %v4156_v58 }
 0x250   : > { %v1698_v32 = vpop.f32.mrf.mxu2 }
 0x251   : > { %v2167_v23 = vmin.f32 %v2103_v19, 0.0  ;;  %v1764_v56 = vadd.f32 %v1698_v32, %v1473_v11  ;;  %v1852_v37 = vpop.f32.mrf.mxu3  ;;  %v1410_v27 = vpop.f32.mrf.mxu1  ;;  %vm2135_vm2 = vcmp.gt.f32.partialorder %v2103_v19, 0.0  ;;  %v4484_v32 = vld [vmem:[#allocation26_spill] sm:$0xff] }
 0x252   : > { %v1474_v47 = vadd.f32 %v1410_v27, %v4481_v48 }
 0x253   : > { %v2790_v1 = vpop.eup %2789  ;;  %v2213_v46 = vmul.f32 1.442695, %v2167_v23  ;;  %v1918_v25 = vadd.f32 %v1852_v37, %v1764_v56 }
 0x254   : > { %v2728_v28 = vadd.f32 -1.0, %v2790_v1  ;;  %v2005_v44 = vpop.f32.mrf.mxu0 }
 0x255   : > { %2791 = vpow2.f32 %v2213_v46  ;;  %v2068_v45 = vadd.f32 %v2002_v15, %v1918_v25 }
 0x256   : > { %v2294_v39 = vsel %vm2134_vm4, %v2102_v49, %v2728_v28 }
 0x257   : > { %2327 = vst.msk [vmem:[%s4017_s15 + $0x68] sm:$0xff] %vm2313_vm5, %v2294_v39  ;;  %v2104_v58 = vadd.f32 %v3983_v22, %v2068_v45 }
 0x258   : > { %v1701_v29 = vpop.f32.mrf.mxu2 }
 0x259   : > { %v2168_v34 = vmin.f32 %v2104_v58, 0.0  ;;  %v1765_v26 = vadd.f32 %v1701_v29, %v1474_v47  ;;  %v1855_v40 = vpop.f32.mrf.mxu3  ;;  %v1413_v33 = vpop.f32.mrf.mxu1  ;;  %vm2136_vm6 = vcmp.gt.f32.partialorder %v2104_v58, 0.0  ;;  %v4485_v29 = vld [vmem:[#allocation7_spill] sm:$0xff] }
 0x25a   : > { %v1475_v4 = vadd.f32 %v1413_v33, %v4482_v54 }
 0x25b   : > { %v2792_v8 = vpop.eup %2791  ;;  %v2215_v62 = vmul.f32 1.442695, %v2168_v34  ;;  %v1919_v5 = vadd.f32 %v1855_v40, %v1765_v26 }
 0x25c   : > { %v2729_v43 = vadd.f32 -1.0, %v2792_v8  ;;  %v2008_v57 = vpop.f32.mrf.mxu0 }
 0x25d   : > { %2793 = vpow2.f32 %v2215_v62  ;;  %v2069_v2 = vadd.f32 %v2005_v44, %v1919_v5 }
 0x25e   : > { %v2295_v3 = vsel %vm2135_vm2, %v2103_v19, %v2729_v43 }
 0x25f   : > { %2328 = vst.msk [vmem:[%s4017_s15 + $0x70] sm:$0xff] %vm2313_vm5, %v2295_v3  ;;  %v2105_v0 = vadd.f32 %v3983_v22, %v2069_v2 }
 0x260   : > { %v1704_v51 = vpop.f32.mrf.mxu2 }
 0x261   : > { %v2169_v21 = vmin.f32 %v2105_v0, 0.0  ;;  %v1766_v7 = vadd.f32 %v1704_v51, %v1475_v4  ;;  %v1858_v17 = vpop.f32.mrf.mxu3  ;;  %v1416_v50 = vpop.f32.mrf.mxu1  ;;  %vm2137_vm7 = vcmp.gt.f32.partialorder %v2105_v0, 0.0  ;;  %v4486_v51 = vld [vmem:[#allocation9_spill] sm:$0xff] }
 0x262   : > { %v1476_v36 = vadd.f32 %v1416_v50, %v4483_v52 }
 0x263   : > { %v2794_v14 = vpop.eup %2793  ;;  %v2217_v53 = vmul.f32 1.442695, %v2169_v21  ;;  %v1920_v24 = vadd.f32 %v1858_v17, %v1766_v7 }
 0x264   : > { %v2730_v59 = vadd.f32 -1.0, %v2794_v14  ;;  %v2011_v41 = vpop.f32.mrf.mxu0 }
 0x265   : > { %2795 = vpow2.f32 %v2217_v53  ;;  %v2070_v10 = vadd.f32 %v2008_v57, %v1920_v24 }
 0x266   : > { %v2296_v49 = vsel %vm2136_vm6, %v2104_v58, %v2730_v59 }
 0x267   : > { %2329 = vst.msk [vmem:[%s4017_s15 + $0x78] sm:$0xff] %vm2313_vm5, %v2296_v49  ;;  %v2106_v13 = vadd.f32 %v3983_v22, %v2070_v10 }
 0x268   : > { %v1707_v18 = vpop.f32.mrf.mxu2 }
 0x269   : > { %v2170_v6 = vmin.f32 %v2106_v13, 0.0  ;;  %v1767_v42 = vadd.f32 %v1707_v18, %v1476_v36  ;;  %v1861_v31 = vpop.f32.mrf.mxu3  ;;  %v1419_v55 = vpop.f32.mrf.mxu1  ;;  %vm2138_vm8 = vcmp.gt.f32.partialorder %v2106_v13, 0.0  ;;  %v4487_v18 = vld [vmem:[#allocation15_spill] sm:$0xff] }
 0x26a   : > { %v1477_v23 = vadd.f32 %v1419_v55, %v4484_v32 }
 0x26b   : > { %v2796_v30 = vpop.eup %2795  ;;  %v2219_v35 = vmul.f32 1.442695, %v2170_v6  ;;  %v1921_v15 = vadd.f32 %v1861_v31, %v1767_v42 }
 0x26c   : > { %v2731_v12 = vadd.f32 -1.0, %v2796_v30  ;;  %v2014_v11 = vpop.f32.mrf.mxu0 }
 0x26d   : > { %2797 = vpow2.f32 %v2219_v35  ;;  %v2071_v16 = vadd.f32 %v2011_v41, %v1921_v15 }
 0x26e   : > { %v2297_v19 = vsel %vm2137_vm7, %v2105_v0, %v2731_v12 }
 0x26f   : > { %2330 = vst.msk [vmem:[%s4017_s15 + $0x80] sm:$0xff] %vm2313_vm5, %v2297_v19  ;;  %v2107_v56 = vadd.f32 %v3983_v22, %v2071_v16 }
 0x270   : > { %v1710_v37 = vpop.f32.mrf.mxu2 }
 0x271   : > { %v2171_v27 = vmin.f32 %v2107_v56, 0.0  ;;  %v1768_v1 = vadd.f32 %v1710_v37, %v1477_v23  ;;  %v1864_v46 = vpop.f32.mrf.mxu3  ;;  %v1422_v25 = vpop.f32.mrf.mxu1  ;;  %vm2139_vm9 = vcmp.gt.f32.partialorder %v2107_v56, 0.0  ;;  %v4488_v37 = vld [vmem:[#allocation30_spill] sm:$0xff] }
 0x272   : > { %v1478_v34 = vadd.f32 %v1422_v25, %v4485_v29 }
 0x273   : > { %v2798_v28 = vpop.eup %2797  ;;  %v2221_v45 = vmul.f32 1.442695, %v2171_v27  ;;  %v1922_v44 = vadd.f32 %v1864_v46, %v1768_v1 }
 0x274   : > { %v2732_v39 = vadd.f32 -1.0, %v2798_v28  ;;  %v2017_v47 = vpop.f32.mrf.mxu0 }
 0x275   : > { %2799 = vpow2.f32 %v2221_v45  ;;  %v2072_v48 = vadd.f32 %v2014_v11, %v1922_v44 }
 0x276   : > { %v2298_v58 = vsel %vm2138_vm8, %v2106_v13, %v2732_v39 }
 0x277   : > { %2331 = vst.msk [vmem:[%s4017_s15 + $0x88] sm:$0xff] %vm2313_vm5, %v2298_v58  ;;  %v2108_v26 = vadd.f32 %v3983_v22, %v2072_v48 }
 0x278   : > { %v1713_v40 = vpop.f32.mrf.mxu2 }
 0x279   : > { %v2172_v33 = vmin.f32 %v2108_v26, 0.0  ;;  %v1769_v8 = vadd.f32 %v1713_v40, %v1478_v34  ;;  %v1867_v62 = vpop.f32.mrf.mxu3  ;;  %v1425_v5 = vpop.f32.mrf.mxu1  ;;  %vm2140_vm10 = vcmp.gt.f32.partialorder %v2108_v26, 0.0  ;;  %v4489_v40 = vld [vmem:[#allocation16_spill] sm:$0xff] }
 0x27a   : > { %v1479_v21 = vadd.f32 %v1425_v5, %v4486_v51 }
 0x27b   : > { %v2800_v43 = vpop.eup %2799  ;;  %v2223_v2 = vmul.f32 1.442695, %v2172_v33  ;;  %v1923_v57 = vadd.f32 %v1867_v62, %v1769_v8 }
 0x27c   : > { %v2733_v3 = vadd.f32 -1.0, %v2800_v43  ;;  %v2020_v4 = vpop.f32.mrf.mxu0 }
 0x27d   : > { %2801 = vpow2.f32 %v2223_v2  ;;  %v2073_v54 = vadd.f32 %v2017_v47, %v1923_v57 }
 0x27e   : > { %v2299_v0 = vsel %vm2139_vm9, %v2107_v56, %v2733_v3 }
 0x27f   : > { %2332 = vst.msk [vmem:[%s4017_s15 + $0x90] sm:$0xff] %vm2313_vm5, %v2299_v0  ;;  %v2109_v7 = vadd.f32 %v3983_v22, %v2073_v54 }
 0x280   : > { %v1716_v17 = vpop.f32.mrf.mxu2 }
 0x281   : > { %v2173_v50 = vmin.f32 %v2109_v7, 0.0  ;;  %v1770_v14 = vadd.f32 %v1716_v17, %v1479_v21  ;;  %v1870_v53 = vpop.f32.mrf.mxu3  ;;  %v1428_v24 = vpop.f32.mrf.mxu1  ;;  %vm2141_vm11 = vcmp.gt.f32.partialorder %v2109_v7, 0.0 }
 0x282   : > { %v1480_v6 = vadd.f32 %v1428_v24, %v4487_v18 }
 0x283   : > { %v2802_v59 = vpop.eup %2801  ;;  %v2225_v10 = vmul.f32 1.442695, %v2173_v50  ;;  %v1924_v41 = vadd.f32 %v1870_v53, %v1770_v14 }
 0x284   : > { %v2734_v49 = vadd.f32 -1.0, %v2802_v59  ;;  %v2023_v36 = vpop.f32.mrf.mxu0 }
 0x285   : > { %2803 = vpow2.f32 %v2225_v10  ;;  %v2074_v52 = vadd.f32 %v2020_v4, %v1924_v41 }
 0x286   : > { %v2300_v13 = vsel %vm2140_vm10, %v2108_v26, %v2734_v49 }
 0x287   : > { %2333 = vst.msk [vmem:[%s4017_s15 + $0x98] sm:$0xff] %vm2313_vm5, %v2300_v13  ;;  %v2110_v42 = vadd.f32 %v3983_v22, %v2074_v52 }
 0x288   : > { %v1719_v31 = vpop.f32.mrf.mxu2 }
 0x289   : > { %v2174_v55 = vmin.f32 %v2110_v42, 0.0  ;;  %v1771_v30 = vadd.f32 %v1719_v31, %v1480_v6  ;;  %v1873_v35 = vpop.f32.mrf.mxu3  ;;  %v1431_v15 = vpop.f32.mrf.mxu1  ;;  %vm2142_vm12 = vcmp.gt.f32.partialorder %v2110_v42, 0.0 }
 0x28a   : > { %v1481_v27 = vadd.f32 %v1431_v15, %v4488_v37 }
 0x28b   : > { %v2804_v12 = vpop.eup %2803  ;;  %v2227_v16 = vmul.f32 1.442695, %v2174_v55  ;;  %v1925_v11 = vadd.f32 %v1873_v35, %v1771_v30 }
 0x28c   : > { %v2735_v19 = vadd.f32 -1.0, %v2804_v12  ;;  %v2026_v23 = vpop.f32.mrf.mxu0 }
 0x28d   : > { %2805 = vpow2.f32 %v2227_v16  ;;  %v2075_v32 = vadd.f32 %v2023_v36, %v1925_v11 }
 0x28e   : > { %v2301_v56 = vsel %vm2141_vm11, %v2109_v7, %v2735_v19 }
 0x28f   : > { %2334 = vst.msk [vmem:[%s4017_s15 + $0xa0] sm:$0xff] %vm2313_vm5, %v2301_v56  ;;  %v2111_v1 = vadd.f32 %v3983_v22, %v2075_v32 }
 0x290   : > { %v1722_v46 = vpop.f32.mrf.mxu2 }
 0x291   : > { %v2175_v25 = vmin.f32 %v2111_v1, 0.0  ;;  %v1772_v28 = vadd.f32 %v1722_v46, %v1481_v27  ;;  %v1876_v45 = vpop.f32.mrf.mxu3  ;;  %v1434_v44 = vpop.f32.mrf.mxu1  ;;  %vm2143_vm13 = vcmp.gt.f32.partialorder %v2111_v1, 0.0 }
 0x292   : > { %v1482_v33 = vadd.f32 %v1434_v44, %v4489_v40 }
 0x293   : > { %v2806_v39 = vpop.eup %2805  ;;  %v2229_v48 = vmul.f32 1.442695, %v2175_v25  ;;  %v1926_v47 = vadd.f32 %v1876_v45, %v1772_v28 }
 0x294   : > { %v2736_v58 = vadd.f32 -1.0, %v2806_v39  ;;  %v2029_v34 = vpop.f32.mrf.mxu0 }
 0x295   : > { %2807 = vpow2.f32 %v2229_v48  ;;  %v2076_v29 = vadd.f32 %v2026_v23, %v1926_v47 }
 0x296   : > { %v2302_v26 = vsel %vm2142_vm12, %v2110_v42, %v2736_v58 }
 0x297   : > { %2335 = vst.msk [vmem:[%s4017_s15 + $0xa8] sm:$0xff] %vm2313_vm5, %v2302_v26  ;;  %v2112_v8 = vadd.f32 %v3983_v22, %v2076_v29 }
 0x298   : > { %v1725_v62 = vpop.f32.mrf.mxu2 }
 0x299   : > { %v2176_v5 = vmin.f32 %v2112_v8, 0.0  ;;  %v1773_v43 = vadd.f32 %v1725_v62, %v1482_v33  ;;  %v1879_v2 = vpop.f32.mrf.mxu3  ;;  %v1437_v57 = vpop.f32.mrf.mxu1  ;;  %vm2144_vm14 = vcmp.gt.f32.partialorder %v2112_v8, 0.0 }
 0x29a   : > { %v1483_v17 = vadd.f32 %v1437_v57, %v3901_v20  ;;  %v4490_v20 = vld [vmem:[#allocation17_spill] sm:$0xff] }
 0x29b   : > { %v2808_v3 = vpop.eup %2807  ;;  %v2231_v54 = vmul.f32 1.442695, %v2176_v5  ;;  %v1927_v4 = vadd.f32 %v1879_v2, %v1773_v43 }
 0x29c   : > { %v2737_v0 = vadd.f32 -1.0, %v2808_v3  ;;  %v2032_v21 = vpop.f32.mrf.mxu0 }
 0x29d   : > { %2809 = vpow2.f32 %v2231_v54  ;;  %v2077_v51 = vadd.f32 %v2029_v34, %v1927_v4 }
 0x29e   : > { %v2303_v7 = vsel %vm2143_vm13, %v2111_v1, %v2737_v0 }
 0x29f   : > { %2336 = vst.msk [vmem:[%s4017_s15 + $0xb0] sm:$0xff] %vm2313_vm5, %v2303_v7  ;;  %v2113_v50 = vadd.f32 %v3983_v22, %v2077_v51  ;;  %v4261_v22 = vld [vmem:[%s4296_s2] ss:$0 sm:$0xff] }
 0x2a0   : > { %v1728_v14 = vpop.f32.mrf.mxu2 }
 0x2a1   : > { %v2177_v53 = vmin.f32 %v2113_v50, 0.0  ;;  %v1774_v24 = vadd.f32 %v1728_v14, %v1483_v17  ;;  %v1882_v59 = vpop.f32.mrf.mxu3  ;;  %v1440_v10 = vpop.f32.mrf.mxu1  ;;  %vm2145_vm15 = vcmp.gt.f32.partialorder %v2113_v50, 0.0 }
 0x2a2   : > { %v1484_v42 = vadd.f32 %v1440_v10, %v4490_v20 }
 0x2a3   : > { %v2810_v41 = vpop.eup %2809  ;;  %v2233_v49 = vmul.f32 1.442695, %v2177_v53  ;;  %v1928_v52 = vadd.f32 %v1882_v59, %v1774_v24 }
 0x2a4   : > { %v2738_v36 = vadd.f32 -1.0, %v2810_v41  ;;  %v2035_v18 = vpop.f32.mrf.mxu0 }
 0x2a5   : > { %2811 = vpow2.f32 %v2233_v49  ;;  %v2078_v13 = vadd.f32 %v2032_v21, %v1928_v52 }
 0x2a6   : > { %v2304_v6 = vsel %vm2144_vm14, %v2112_v8, %v2738_v36 }
 0x2a7   : > { %2337 = vst.msk [vmem:[%s4017_s15 + $0xb8] sm:$0xff] %vm2313_vm5, %v2304_v6  ;;  %v2114_v31 = vadd.f32 %v4261_v22, %v2078_v13 }
 0x2a8   : > { %v1731_v55 = vpop.f32.mrf.mxu2 }
 0x2a9   : > { %v2178_v30 = vmin.f32 %v2114_v31, 0.0  ;;  %v1775_v35 = vadd.f32 %v1731_v55, %v1484_v42  ;;  %v1885_v15 = vpop.f32.mrf.mxu3  ;;  %v1443_v12 = vpop.f32.mrf.mxu1  ;;  %vm2146_vm0 = vcmp.gt.f32.partialorder %v2114_v31, 0.0 }
 0x2aa   : > { %v1485_v27 = vadd.f32 %v1443_v12, %v3922_v61 }
 0x2ab   : > { %v2812_v16 = vpop.eup %2811  ;;  %v2235_v11 = vmul.f32 1.442695, %v2178_v30  ;;  %v1929_v19 = vadd.f32 %v1885_v15, %v1775_v35 }
 0x2ac   : > { %v2739_v32 = vadd.f32 -1.0, %v2812_v16  ;;  %v2038_v56 = vpop.f32.mrf.mxu0 }
 0x2ad   : > { %2813 = vpow2.f32 %v2235_v11  ;;  %v2079_v23 = vadd.f32 %v2035_v18, %v1929_v19 }
 0x2ae   : > { %v2305_v37 = vsel %vm2145_vm15, %v2113_v50, %v2739_v32 }
 0x2af   : > { %2338 = vst.msk [vmem:[%s4017_s15 + $0xc0] sm:$0xff] %vm2313_vm5, %v2305_v37  ;;  %v2115_v1 = vadd.f32 %v4261_v22, %v2079_v23 }
 0x2b0   : > { %v1734_v46 = vpop.f32.mrf.mxu2 }
 0x2b1   : > { %v2179_v25 = vmin.f32 %v2115_v1, 0.0  ;;  %v1776_v28 = vadd.f32 %v1734_v46, %v1485_v27  ;;  %v1888_v45 = vpop.f32.mrf.mxu3  ;;  %v1446_v44 = vpop.f32.mrf.mxu1  ;;  %vm2147_vm1 = vcmp.gt.f32.partialorder %v2115_v1, 0.0 }
 0x2b2   : > { %v1486_v61 = vadd.f32 %v1446_v44, %v3932_v63 }
 0x2b3   : > { %v2814_v39 = vpop.eup %2813  ;;  %v2237_v48 = vmul.f32 1.442695, %v2179_v25  ;;  %v1930_v47 = vadd.f32 %v1888_v45, %v1776_v28 }
 0x2b4   : > { %v2740_v58 = vadd.f32 -1.0, %v2814_v39  ;;  %v2041_v34 = vpop.f32.mrf.mxu0 }
 0x2b5   : > { %2815 = vpow2.f32 %v2237_v48  ;;  %v2080_v29 = vadd.f32 %v2038_v56, %v1930_v47 }
 0x2b6   : > { %v2306_v26 = vsel %vm2146_vm0, %v2114_v31, %v2740_v58 }
 0x2b7   : > { %2339 = vst.msk [vmem:[%s4017_s15 + $0xc8] sm:$0xff] %vm2313_vm5, %v2306_v26  ;;  %v2116_v40 = vadd.f32 %v4261_v22, %v2080_v29 }
 0x2b8   : > { %v1737_v33 = vpop.f32.mrf.mxu2 }
 0x2b9   : > { %v2180_v8 = vmin.f32 %v2116_v40, 0.0  ;;  %v1777_v62 = vadd.f32 %v1737_v33, %v1486_v61  ;;  %v1891_v5 = vpop.f32.mrf.mxu3  ;;  %v1449_v43 = vpop.f32.mrf.mxu1  ;;  %vm2148_vm3 = vcmp.gt.f32.partialorder %v2116_v40, 0.0 }
 0x2ba   : > { %v1487_v63 = vadd.f32 %v1449_v43, %v3943_v38 }
 0x2bb   : > { %v2816_v2 = vpop.eup %2815  ;;  %v2239_v57 = vmul.f32 1.442695, %v2180_v8  ;;  %v1931_v3 = vadd.f32 %v1891_v5, %v1777_v62 }
 0x2bc   : > { %v2741_v54 = vadd.f32 -1.0, %v2816_v2  ;;  %v2044_v51 = vpop.f32.mrf.mxu0 }
 0x2bd   : > { %2817 = vpow2.f32 %v2239_v57  ;;  %v2081_v4 = vadd.f32 %v2041_v34, %v1931_v3 }
 0x2be   : > { %v2307_v0 = vsel %vm2147_vm1, %v2115_v1, %v2741_v54 }
 0x2bf   : > { %2340 = vst.msk [vmem:[%s4017_s15 + $0xd0] sm:$0xff] %vm2313_vm5, %v2307_v0  ;;  %v2117_v21 = vadd.f32 %v4261_v22, %v2081_v4 }
 0x2c0   : > { %v1740_v7 = vpop.f32.mrf.mxu2 }
 0x2c1   : > { %v2181_v17 = vmin.f32 %v2117_v21, 0.0  ;;  %v1778_v50 = vadd.f32 %v1740_v7, %v1487_v63  ;;  %v1894_v14 = vpop.f32.mrf.mxu3  ;;  %v1452_v53 = vpop.f32.mrf.mxu1  ;;  %vm2149_vm4 = vcmp.gt.f32.partialorder %v2117_v21, 0.0 }
 0x2c2   : > { %v1488_v36 = vadd.f32 %v1452_v53, %v3953_v9 }
 0x2c3   : > { %v2818_v24 = vpop.eup %2817  ;;  %v2241_v59 = vmul.f32 1.442695, %v2181_v17  ;;  %v1932_v10 = vadd.f32 %v1894_v14, %v1778_v50 }
 0x2c4   : > { %v2742_v41 = vadd.f32 -1.0, %v2818_v24  ;;  %v2047_v18 = vpop.f32.mrf.mxu0 }
 0x2c5   : > { %2819 = vpow2.f32 %v2241_v59  ;;  %v2082_v49 = vadd.f32 %v2044_v51, %v1932_v10 }
 0x2c6   : > { %v2308_v52 = vsel %vm2148_vm3, %v2116_v40, %v2742_v41 }
 0x2c7   : > { %2341 = vst.msk [vmem:[%s4017_s15 + $0xd8] sm:$0xff] %vm2313_vm5, %v2308_v52  ;;  %v2118_v38 = vadd.f32 %v4261_v22, %v2082_v49 }
 0x2c8   : > { %v1743_v13 = vpop.f32.mrf.mxu2 }
 0x2c9   : > { %v2182_v6 = vmin.f32 %v2118_v38, 0.0  ;;  %v1779_v20 = vadd.f32 %v1743_v13, %v1488_v36  ;;  %v1897_v42 = vpop.f32.mrf.mxu3  ;;  %v1455_v15 = vpop.f32.mrf.mxu1  ;;  %vm2150_vm2 = vcmp.gt.f32.partialorder %v2118_v38, 0.0 }
 0x2ca   : > { %v1489_v9 = vadd.f32 %v1455_v15, %v3967_v60 }
 0x2cb   : > { %v2820_v31 = vpop.eup %2819  ;;  %v2243_v55 = vmul.f32 1.442695, %v2182_v6  ;;  %v1933_v30 = vadd.f32 %v1897_v42, %v1779_v20 }
 0x2cc   : > { %v2743_v35 = vadd.f32 -1.0, %v2820_v31  ;;  %v2050_v37 = vpop.f32.mrf.mxu0 }
 0x2cd   : > { %2821 = vpow2.f32 %v2243_v55  ;;  %v2083_v12 = vadd.f32 %v2047_v18, %v1933_v30 }
 0x2ce   : > { %v2309_v16 = vsel %vm2149_vm4, %v2117_v21, %v2743_v35 }
 0x2cf   : > { %2342 = vst.msk [vmem:[%s4017_s15 + $0xe0] sm:$0xff] %vm2313_vm5, %v2309_v16  ;;  %v2119_v11 = vadd.f32 %v4261_v22, %v2083_v12 }
 0x2d0   : > { %v1746_v19 = vpop.f32.mrf.mxu2 }
 0x2d1   : > { %v2183_v32 = vmin.f32 %v2119_v11, 0.0  ;;  %v1780_v23 = vadd.f32 %v1746_v19, %v1489_v9  ;;  %v1900_v56 = vpop.f32.mrf.mxu3  ;;  %vm2151_vm6 = vcmp.gt.f32.partialorder %v2119_v11, 0.0 }
 0x2d3   : > { %v2822_v27 = vpop.eup %2821  ;;  %v2245_v1 = vmul.f32 1.442695, %v2183_v32  ;;  %v1934_v46 = vadd.f32 %v1900_v56, %v1780_v23 }
 0x2d4   : > { %v2744_v25 = vadd.f32 -1.0, %v2822_v27 }
 0x2d5   : > { %2823 = vpow2.f32 %v2245_v1  ;;  %v2084_v28 = vadd.f32 %v2050_v37, %v1934_v46 }
 0x2d6   : > { %v2310_v45 = vsel %vm2150_vm2, %v2118_v38, %v2744_v25 }
 0x2d7   : > { %2343 = vst.msk [vmem:[%s4017_s15 + $0xe8] sm:$0xff] %vm2313_vm5, %v2310_v45  ;;  %v2120_v60 = vadd.f32 %v4261_v22, %v2084_v28 }
 0x2d9   : > { %v2184_v44 = vmin.f32 %v2120_v60, 0.0  ;;  %vm2152_vm7 = vcmp.gt.f32.partialorder %v2120_v60, 0.0 }
 0x2db   : > { %v2824_v39 = vpop.eup %2823  ;;  %v2247_v48 = vmul.f32 1.442695, %v2184_v44 }
 0x2dc   : > { %v2745_v47 = vadd.f32 -1.0, %v2824_v39 }
 0x2dd   : > { %2825 = vpow2.f32 %v2247_v48 }
 0x2de   : > { %v2311_v58 = vsel %vm2151_vm6, %v2119_v11, %v2745_v47 }
 0x2df   : > { %2344 = vst.msk [vmem:[%s4017_s15 + $0xf0] sm:$0xff] %vm2313_vm5, %v2311_v58 }
 0x2e3   : > { %v2826_v29 = vpop.eup %2825 }
 0x2e4   : > { %v2746_v34 = vadd.f32 -1.0, %v2826_v29 }
 0x2e6   : > { %v2312_v26 = vsel %vm2152_vm7, %v2120_v60, %v2746_v34 }
 0x2e7   : > { %2345 = vst.msk [vmem:[%s4017_s15 + $0xf8] sm:$0xff] %vm2313_vm5, %v2312_v26 }
 0x2e8 PF: > { %s13_s12 = sadd.s32 1, %s2834_s12  }
 0x2e9   : > { %p10_p4 = scmp.ge.s32.totalorder %s13_s12, 4  }
 0x2eb   :  { %12 = sbr.rel (!%p10_p4) target bundleno = 1 (0x1), region = 70 }

</bundles_post_ra>
